<compile_context>
chip_gen: v6e
topology: v6e:2x2x1
jax: 0.10.0
libtpu: 0.0.40
codegen_flags: <defaults>
</compile_context>

<pallas_src>
import functools

import jax
import jax.numpy as jnp
from jax import lax
from jax.experimental import pallas as pl
from jax.experimental.pallas import tpu as pltpu


def _round_up(v, d):
    return (v + d - 1) // d * d


def _pick_tb(B):
    """Generation-aware batch-tile rows, minimizing padding waste."""
    kind = ""
    try:
        kind = jax.devices()[0].device_kind.lower()
    except Exception:
        pass
    is_v5 = "v5" in kind
    is_v7 = ("7" in kind) and not is_v5 and ("v6" not in kind)
    target = 128 if is_v5 else 256   # v5e: 4x128 MXU, no bf16 VALU, 1 vst slot
    ntiles = max(1, (B + target - 1) // target)
    if is_v7:
        # dimension_semantics=("parallel",) only uses both TensorCores on v7x
        # if the grid has >= 2 balanced steps.
        if ntiles == 1 and B >= 16:
            ntiles = 2
        elif ntiles > 1 and ntiles % 2 == 1:
            ntiles += 1
    return _round_up((B + ntiles - 1) // ntiles, 8)


# --------------------------------- kernel -----------------------------------
def _nuspan1_kernel(x_ref, weT_ref, sT_ref, thr_ref, z_ref, wx_ref,
                    *, maxit, omega1, omega2, omega3):
    # wx = x @ We^T (bf16 inputs, f32 accumulation on the MXU).  Constant
    # across iterations (matches PyTorch self._We(x)); parked in VMEM scratch
    # so it is not live in vregs across the unfolded loop.
    wx = jnp.dot(x_ref[...], weT_ref[...], preferred_element_type=jnp.float32)
    wx_ref[...] = wx

    sign_mask = jnp.uint32(0x80000000)

    def combine(c, rows):
        # rows: (8, n_pad) slab of host-precomputed per-iteration parameters.
        l1 = rows[0:1, :]            # lambda1
        l2 = rows[1:2, :]            # lambda2
        gr = rows[2:3, :]            # gama / (gama - 1)
        l3 = rows[3:4, :]            # lambda3
        tl3 = rows[4:5, :]           # 2 * lambda3
        al3 = rows[5:6, :]           # a * lambda3
        c1 = rows[6:7, :]            # (a - 1) / (a - 2)
        c2 = rows[7:8, :]            # a * lambda3 / (a - 2)

        # Magnitude-only penalties (non-negative for the module's parameter
        # ranges); the sign of c is re-applied once at the end.
        ax = jnp.abs(c)
        soft_m = jnp.maximum(ax - l1, 0.0)                          # soft
        firm_m = jnp.minimum(ax, jnp.maximum(gr * (ax - l2), 0.0))  # firm
        scad_m = jnp.where(                                         # scad
            ax <= tl3,
            jnp.maximum(ax - l3, 0.0),
            jnp.where(ax <= al3, c1 * ax - c2, ax))
        mag = omega1 * soft_m + omega2 * firm_m + omega3 * scad_m
        # copysign(mag, c) via bit ops (mag >= 0, so its sign bit is clear).
        sgn = pltpu.bitcast(c, jnp.uint32) & sign_mask
        return pltpu.bitcast(pltpu.bitcast(mag, jnp.uint32) | sgn,
                             jnp.float32)

    z = combine(wx, thr_ref[0])

    def step(z, rows):
        # Read S^T from VMEM per matmul (do not pin it in vregs across the
        # loop); the MXU has huge slack so the reload is free.
        c = wx_ref[...] + jnp.dot(z.astype(jnp.bfloat16), sT_ref[...],
                                  preferred_element_type=jnp.float32)
        return combine(c, rows)

    if maxit <= 8:
        # Small static trip count: unroll (LLO scheduler visibility).
        for i in range(1, maxit):
            z = step(z, thr_ref[i])
    else:
        # Larger trip counts: keep the working set at one iteration.
        z = lax.fori_loop(1, maxit, lambda i, zz: step(zz, thr_ref[i]), z)

    z_ref[...] = z.astype(z_ref.dtype)


# --------------------------------- wrapper -----------------------------------
def nuspan1_forward(x, We, S, lam1, lam2, gam, lam3, a,
                    *, maxit, omega1, omega2, omega3, tb=None):
    """x: (B, m) f32;  We: (n, m);  S: (n, n);  lam*/gam/a: (maxit, n)."""
    B, m = x.shape
    n = We.shape[0]

    m_pad = _round_up(m, 128)      # lane-dense contraction dim
    n_pad = _round_up(n, 128)      # lane-dense feature dim (unmasked stores)
    tb = _pick_tb(B) if tb is None else _round_up(tb, 8)
    B_pad = _round_up(B, tb)

    # bf16 operands for the MXU (f32 accumulation inside the kernel).
    x_p = jnp.zeros((B_pad, m_pad), jnp.bfloat16).at[:B, :m].set(
        x.astype(jnp.bfloat16))
    weT = jnp.zeros((m_pad, n_pad), jnp.bfloat16).at[:m, :n].set(
        We.T.astype(jnp.bfloat16))
    sT = jnp.zeros((n_pad, n_pad), jnp.bfloat16).at[:n, :n].set(
        S.T.astype(jnp.bfloat16))

    def pad_row(r):  # edge-pad so padded-lane denominators stay benign
        return jnp.pad(r.astype(jnp.float32), ((0, 0), (0, n_pad - n)),
                       mode="edge")

    l1, l2, g = pad_row(lam1), pad_row(lam2), pad_row(gam)
    l3, aa = pad_row(lam3), pad_row(a)
    # Host-side precompute removes every per-element divide from the kernel.
    # TODO(synk): guard g -> 1 and a -> 2 if these parameters become trainable.
    thr = jnp.stack(
        [l1,
         l2,
         g / (g - 1.0),
         l3,
         2.0 * l3,
         aa * l3,
         (aa - 1.0) / (aa - 2.0),
         aa * l3 / (aa - 2.0)],
        axis=1)                                  # (maxit, 8, n_pad) f32

    kernel = functools.partial(_nuspan1_kernel, maxit=maxit,
                               omega1=omega1, omega2=omega2, omega3=omega3)

    def call(single_buffer_residents):
        def const_spec(shape, imap):
            # Grid-constant residents are never re-fetched; a single buffer
            # halves their VMEM footprint (matters for large n on v7x).
            if single_buffer_residents:
                return pl.BlockSpec(shape, imap, pipeline_mode=pl.Buffered(1))
            return pl.BlockSpec(shape, imap)

        return pl.pallas_call(
            kernel,
            out_shape=jax.ShapeDtypeStruct((B_pad, n_pad), jnp.float32),
            grid=(B_pad // tb,),
            in_specs=[
                pl.BlockSpec((tb, m_pad), lambda i: (i, 0)),         # x tile
                const_spec((m_pad, n_pad), lambda i: (0, 0)),        # We^T
                const_spec((n_pad, n_pad), lambda i: (0, 0)),        # S^T
                const_spec((maxit, 8, n_pad), lambda i: (0, 0, 0)),  # thr
            ],
            out_specs=pl.BlockSpec((tb, n_pad), lambda i: (i, 0)),
            scratch_shapes=[pltpu.VMEM((tb, n_pad), jnp.float32)],   # wx
            compiler_params=pltpu.CompilerParams(
                dimension_semantics=("parallel",),   # megacore / 2-TC split
                vmem_limit_bytes=48 * 1024 * 1024),  # fits v7x's 64 MiB VMEM
        )(x_p, weT, sT, thr)

    try:
        z_pad = call(True)
    except Exception:
        # Fallback if this lowering path rejects pl.Buffered(1) on pallas_call
        # inputs; only costs VMEM (residents are grid-constant either way).
        z_pad = call(False)

    return z_pad[:B, :n]


# --------------------------- pure-JAX reference ------------------------------
def nuspan1_reference(x, We, S, lam1, lam2, gam, lam3, a,
                      *, maxit, omega1, omega2, omega3,
                      matmul_dtype=jnp.float32):
    weT = We.T.astype(matmul_dtype)
    sT = S.T.astype(matmul_dtype)
    wx = jnp.dot(x.astype(matmul_dtype), weT,
                 preferred_element_type=jnp.float32)

    def combine(c, i):
        l1 = lam1[i][None, :]
        l2 = lam2[i][None, :]
        g = gam[i][None, :]
        l3 = lam3[i][None, :]
        av = a[i][None, :]
        ax = jnp.abs(c)
        sg = jnp.sign(c)
        soft = sg * jnp.maximum(ax - l1, 0.0)
        firm = sg * jnp.minimum(ax, jnp.maximum(g / (g - 1.0) * (ax - l2), 0.0))
        sc = c
        mid = ((av - 1.0) * c - sg * av * l3) / (av - 2.0)
        sc = jnp.where((ax > 2.0 * l3) & (ax <= av * l3), mid, sc)
        sc = jnp.where(ax <= 2.0 * l3, sg * jnp.maximum(ax - l3, 0.0), sc)
        return omega1 * soft + omega2 * firm + omega3 * sc

    z = combine(wx, 0)
    for i in range(1, maxit):
        c = wx + jnp.dot(z.astype(matmul_dtype), sT,
                         preferred_element_type=jnp.float32)
        z = combine(c, i)
    return z


if __name__ == "__main__":
    # Small, deterministic problem: m == n (required by the module's broadcast).
    B, m, n, maxit = 8, 32, 32, 4
    omega1 = omega2 = omega3 = 1.0 / 3.0
    lambda1_int, mu1_int, gama1_int, nu1_int, a1_int = 0.1, 0.1, 3.0, 0.1, 3.7

    key = jax.random.PRNGKey(0)
    kx, kd = jax.random.split(key)
    x = jax.random.normal(kx, (B, m), dtype=jnp.float32)
    D = jax.random.normal(kd, (m, n), dtype=jnp.float32) / jnp.sqrt(m)

    # weights_init():  We = (1/L) D^T,   S = I - (1/L) D^T D
    L = float(jnp.linalg.norm(D.T @ D))  # Frobenius norm >= spectral norm
    We = (1.0 / L) * D.T                                        # (n, m)
    S = jnp.eye(n, dtype=jnp.float32) - (1.0 / L) * (D.T @ D)   # (n, n)

    # Per-iteration thresholds as (maxit, n) rows (== lambda[:, i].T).
    lam1 = jnp.full((maxit, n), lambda1_int, jnp.float32)
    lam2 = jnp.full((maxit, n), mu1_int, jnp.float32)
    gam = jnp.full((maxit, n), gama1_int, jnp.float32)
    lam3 = jnp.full((maxit, n), nu1_int, jnp.float32)
    a = jnp.full((maxit, n), a1_int, jnp.float32)

    z = nuspan1_forward(x, We, S, lam1, lam2, gam, lam3, a,
                        maxit=maxit, omega1=omega1, omega2=omega2,
                        omega3=omega3)
    z = jax.block_until_ready(z)
    assert z.shape == (B, n)

    # Reference with matched matmul precision (bf16 MXU inputs, f32 accumulate).
    z_ref_bf16 = nuspan1_reference(x, We, S, lam1, lam2, gam, lam3, a,
                                   maxit=maxit, omega1=omega1, omega2=omega2,
                                   omega3=omega3, matmul_dtype=jnp.bfloat16)
    assert jnp.allclose(z, z_ref_bf16, atol=1e-4, rtol=1e-4), (
        float(jnp.max(jnp.abs(z - z_ref_bf16))))

    # Sanity check against the full-f32 module semantics (looser: bf16 matmul
    # rounding compounds over maxit unfolded iterations).
    z_ref_f32 = nuspan1_reference(x, We, S, lam1, lam2, gam, lam3, a,
                                  maxit=maxit, omega1=omega1, omega2=omega2,
                                  omega3=omega3, matmul_dtype=jnp.float32)
    assert jnp.allclose(z, z_ref_f32, atol=5e-2, rtol=5e-2), (
        float(jnp.max(jnp.abs(z - z_ref_f32))))

    print("KERNEL_OK")
</pallas_src>

<mosaic_0001>
module attributes {stable_mosaic.version = 11 : i64} {
  func.func @_nuspan1_kernel(%arg0: i32, %arg1: memref<8x128xbf16, #tpu.memory_space<vmem>>, %arg2: memref<128x128xbf16, #tpu.memory_space<vmem>>, %arg3: memref<128x128xbf16, #tpu.memory_space<vmem>>, %arg4: memref<4x8x128xf32, #tpu.memory_space<vmem>>, %arg5: memref<8x128xf32, #tpu.memory_space<vmem>>, %arg6: memref<8x128xf32, #tpu.memory_space<vmem>>) attributes {dimension_semantics = [#tpu.dimension_semantics<parallel>], iteration_bounds = array<i64: 1>, scalar_prefetch = 0 : i64, scratch_operands = 1 : i64, tpu.core_type = #tpu.core_type<tc>, window_params = [{transform_indices = @transform_0, window_bounds = array<i64: 8, 128>}, {pipeline_mode = #tpu.pipeline_mode<synchronous>, transform_indices = @transform_1, window_bounds = array<i64: 128, 128>}, {pipeline_mode = #tpu.pipeline_mode<synchronous>, transform_indices = @transform_2, window_bounds = array<i64: 128, 128>}, {pipeline_mode = #tpu.pipeline_mode<synchronous>, transform_indices = @transform_3, window_bounds = array<i64: 4, 8, 128>}, {transform_indices = @transform_4, window_bounds = array<i64: 8, 128>}]} {
    %c0 = arith.constant 0 : index
    %c0_0 = arith.constant 0 : index
    %0 = vector.load %arg1[%c0, %c0_0] : memref<8x128xbf16, #tpu.memory_space<vmem>>, vector<8x128xbf16>
    %c0_1 = arith.constant 0 : index
    %c0_2 = arith.constant 0 : index
    %1 = vector.load %arg2[%c0_1, %c0_2] : memref<128x128xbf16, #tpu.memory_space<vmem>>, vector<128x128xbf16>
    %cst = arith.constant dense<0.000000e+00> : vector<8x128xf32>
    %2 = tpu.matmul %0, %1, %cst {dimension_numbers = #tpu.dot_dimension_numbers<[1], [0], [0], [1], [0, 0, 1, 1], [], []>} : vector<8x128xbf16>, vector<128x128xbf16>, vector<8x128xf32> -> vector<8x128xf32>
    %c0_3 = arith.constant 0 : index
    %c0_4 = arith.constant 0 : index
    %3 = vector.load %arg6[%c0_3, %c0_4] : memref<8x128xf32, #tpu.memory_space<vmem>>, vector<8x128xf32>
    tpu.vector_store %arg6[%c0_3, %c0_4], %2 {strides = array<i32>} : memref<8x128xf32, #tpu.memory_space<vmem>>, vector<8x128xf32>,
    %c0_5 = arith.constant 0 : index
    %c0_6 = arith.constant 0 : index
    %c0_7 = arith.constant 0 : index
    %4 = vector.load %arg4[%c0_5, %c0_6, %c0_7] : memref<4x8x128xf32, #tpu.memory_space<vmem>>, vector<1x8x128xf32>
    %5 = vector.shape_cast %4 : vector<1x8x128xf32> to vector<8x128xf32>
    %6 = vector.extract_strided_slice %5 {offsets = [0, 0], sizes = [1, 128], strides = [1, 1]} : vector<8x128xf32> to vector<1x128xf32>
    %7 = vector.extract_strided_slice %5 {offsets = [1, 0], sizes = [1, 128], strides = [1, 1]} : vector<8x128xf32> to vector<1x128xf32>
    %8 = vector.extract_strided_slice %5 {offsets = [2, 0], sizes = [1, 128], strides = [1, 1]} : vector<8x128xf32> to vector<1x128xf32>
    %9 = vector.extract_strided_slice %5 {offsets = [3, 0], sizes = [1, 128], strides = [1, 1]} : vector<8x128xf32> to vector<1x128xf32>
    %10 = vector.extract_strided_slice %5 {offsets = [4, 0], sizes = [1, 128], strides = [1, 1]} : vector<8x128xf32> to vector<1x128xf32>
    %11 = vector.extract_strided_slice %5 {offsets = [5, 0], sizes = [1, 128], strides = [1, 1]} : vector<8x128xf32> to vector<1x128xf32>
    %12 = vector.extract_strided_slice %5 {offsets = [6, 0], sizes = [1, 128], strides = [1, 1]} : vector<8x128xf32> to vector<1x128xf32>
    %13 = vector.extract_strided_slice %5 {offsets = [7, 0], sizes = [1, 128], strides = [1, 1]} : vector<8x128xf32> to vector<1x128xf32>
    %14 = math.absf %2 : vector<8x128xf32>
    %15 = vector.broadcast %6 : vector<1x128xf32> to vector<8x128xf32>
    %16 = arith.subf %14, %15 : vector<8x128xf32>
    %cst_8 = arith.constant 0.000000e+00 : f32
    %17 = vector.broadcast %cst_8 : f32 to vector<8x128xf32>
    %18 = arith.maximumf %16, %17 : vector<8x128xf32>
    %19 = vector.broadcast %7 : vector<1x128xf32> to vector<8x128xf32>
    %20 = arith.subf %14, %19 : vector<8x128xf32>
    %21 = vector.broadcast %8 : vector<1x128xf32> to vector<8x128xf32>
    %22 = arith.mulf %21, %20 : vector<8x128xf32>
    %cst_9 = arith.constant 0.000000e+00 : f32
    %23 = vector.broadcast %cst_9 : f32 to vector<8x128xf32>
    %24 = arith.maximumf %22, %23 : vector<8x128xf32>
    %25 = arith.minimumf %14, %24 : vector<8x128xf32>
    %26 = vector.broadcast %10 : vector<1x128xf32> to vector<8x128xf32>
    %27 = arith.cmpf ole, %14, %26 : vector<8x128xf32>
    %28 = vector.broadcast %9 : vector<1x128xf32> to vector<8x128xf32>
    %29 = arith.subf %14, %28 : vector<8x128xf32>
    %cst_10 = arith.constant 0.000000e+00 : f32
    %30 = vector.broadcast %cst_10 : f32 to vector<8x128xf32>
    %31 = arith.maximumf %29, %30 : vector<8x128xf32>
    %32 = vector.broadcast %11 : vector<1x128xf32> to vector<8x128xf32>
    %33 = arith.cmpf ole, %14, %32 : vector<8x128xf32>
    %34 = vector.broadcast %12 : vector<1x128xf32> to vector<8x128xf32>
    %35 = arith.mulf %34, %14 : vector<8x128xf32>
    %36 = vector.broadcast %13 : vector<1x128xf32> to vector<8x128xf32>
    %37 = arith.subf %35, %36 : vector<8x128xf32>
    %38 = arith.select %33, %37, %14 : vector<8x128xi1>, vector<8x128xf32>
    %39 = arith.select %27, %31, %38 : vector<8x128xi1>, vector<8x128xf32>
    %cst_11 = arith.constant 0.333333343 : f32
    %40 = vector.broadcast %cst_11 : f32 to vector<8x128xf32>
    %41 = arith.mulf %40, %18 : vector<8x128xf32>
    %cst_12 = arith.constant 0.333333343 : f32
    %42 = vector.broadcast %cst_12 : f32 to vector<8x128xf32>
    %43 = arith.mulf %42, %25 : vector<8x128xf32>
    %44 = arith.addf %41, %43 : vector<8x128xf32>
    %cst_13 = arith.constant 0.333333343 : f32
    %45 = vector.broadcast %cst_13 : f32 to vector<8x128xf32>
    %46 = arith.mulf %45, %39 : vector<8x128xf32>
    %47 = arith.addf %44, %46 : vector<8x128xf32>
    %48 = tpu.bitcast %2 : vector<8x128xf32> -> vector<8x128xi32>
    %c-2147483648_i32 = arith.constant -2147483648 : i32
    %49 = vector.broadcast %c-2147483648_i32 : i32 to vector<8x128xi32>
    %50 = arith.andi %48, %49 : vector<8x128xi32>
    %51 = tpu.bitcast %47 : vector<8x128xf32> -> vector<8x128xi32>
    %52 = arith.ori %51, %50 : vector<8x128xi32>
    %53 = tpu.bitcast %52 : vector<8x128xi32> -> vector<8x128xf32>
    %c1 = arith.constant 1 : index
    %c0_14 = arith.constant 0 : index
    %c0_15 = arith.constant 0 : index
    %54 = vector.load %arg4[%c1, %c0_14, %c0_15] : memref<4x8x128xf32, #tpu.memory_space<vmem>>, vector<1x8x128xf32>
    %55 = vector.shape_cast %54 : vector<1x8x128xf32> to vector<8x128xf32>
    %c0_16 = arith.constant 0 : index
    %c0_17 = arith.constant 0 : index
    %56 = vector.load %arg6[%c0_16, %c0_17] : memref<8x128xf32, #tpu.memory_space<vmem>>, vector<8x128xf32>
    %57 = arith.truncf %53 : vector<8x128xf32> to vector<8x128xbf16>
    %c0_18 = arith.constant 0 : index
    %c0_19 = arith.constant 0 : index
    %58 = vector.load %arg3[%c0_18, %c0_19] : memref<128x128xbf16, #tpu.memory_space<vmem>>, vector<128x128xbf16>
    %cst_20 = arith.constant dense<0.000000e+00> : vector<8x128xf32>
    %59 = tpu.matmul %57, %58, %cst_20 {dimension_numbers = #tpu.dot_dimension_numbers<[1], [0], [0], [1], [0, 0, 1, 1], [], []>} : vector<8x128xbf16>, vector<128x128xbf16>, vector<8x128xf32> -> vector<8x128xf32>
    %60 = arith.addf %56, %59 : vector<8x128xf32>
    %61 = vector.extract_strided_slice %55 {offsets = [0, 0], sizes = [1, 128], strides = [1, 1]} : vector<8x128xf32> to vector<1x128xf32>
    %62 = vector.extract_strided_slice %55 {offsets = [1, 0], sizes = [1, 128], strides = [1, 1]} : vector<8x128xf32> to vector<1x128xf32>
    %63 = vector.extract_strided_slice %55 {offsets = [2, 0], sizes = [1, 128], strides = [1, 1]} : vector<8x128xf32> to vector<1x128xf32>
    %64 = vector.extract_strided_slice %55 {offsets = [3, 0], sizes = [1, 128], strides = [1, 1]} : vector<8x128xf32> to vector<1x128xf32>
    %65 = vector.extract_strided_slice %55 {offsets = [4, 0], sizes = [1, 128], strides = [1, 1]} : vector<8x128xf32> to vector<1x128xf32>
    %66 = vector.extract_strided_slice %55 {offsets = [5, 0], sizes = [1, 128], strides = [1, 1]} : vector<8x128xf32> to vector<1x128xf32>
    %67 = vector.extract_strided_slice %55 {offsets = [6, 0], sizes = [1, 128], strides = [1, 1]} : vector<8x128xf32> to vector<1x128xf32>
    %68 = vector.extract_strided_slice %55 {offsets = [7, 0], sizes = [1, 128], strides = [1, 1]} : vector<8x128xf32> to vector<1x128xf32>
    %69 = math.absf %60 : vector<8x128xf32>
    %70 = vector.broadcast %61 : vector<1x128xf32> to vector<8x128xf32>
    %71 = arith.subf %69, %70 : vector<8x128xf32>
    %cst_21 = arith.constant 0.000000e+00 : f32
    %72 = vector.broadcast %cst_21 : f32 to vector<8x128xf32>
    %73 = arith.maximumf %71, %72 : vector<8x128xf32>
    %74 = vector.broadcast %62 : vector<1x128xf32> to vector<8x128xf32>
    %75 = arith.subf %69, %74 : vector<8x128xf32>
    %76 = vector.broadcast %63 : vector<1x128xf32> to vector<8x128xf32>
    %77 = arith.mulf %76, %75 : vector<8x128xf32>
    %cst_22 = arith.constant 0.000000e+00 : f32
    %78 = vector.broadcast %cst_22 : f32 to vector<8x128xf32>
    %79 = arith.maximumf %77, %78 : vector<8x128xf32>
    %80 = arith.minimumf %69, %79 : vector<8x128xf32>
    %81 = vector.broadcast %65 : vector<1x128xf32> to vector<8x128xf32>
    %82 = arith.cmpf ole, %69, %81 : vector<8x128xf32>
    %83 = vector.broadcast %64 : vector<1x128xf32> to vector<8x128xf32>
    %84 = arith.subf %69, %83 : vector<8x128xf32>
    %cst_23 = arith.constant 0.000000e+00 : f32
    %85 = vector.broadcast %cst_23 : f32 to vector<8x128xf32>
    %86 = arith.maximumf %84, %85 : vector<8x128xf32>
    %87 = vector.broadcast %66 : vector<1x128xf32> to vector<8x128xf32>
    %88 = arith.cmpf ole, %69, %87 : vector<8x128xf32>
    %89 = vector.broadcast %67 : vector<1x128xf32> to vector<8x128xf32>
    %90 = arith.mulf %89, %69 : vector<8x128xf32>
    %91 = vector.broadcast %68 : vector<1x128xf32> to vector<8x128xf32>
    %92 = arith.subf %90, %91 : vector<8x128xf32>
    %93 = arith.select %88, %92, %69 : vector<8x128xi1>, vector<8x128xf32>
    %94 = arith.select %82, %86, %93 : vector<8x128xi1>, vector<8x128xf32>
    %cst_24 = arith.constant 0.333333343 : f32
    %95 = vector.broadcast %cst_24 : f32 to vector<8x128xf32>
    %96 = arith.mulf %95, %73 : vector<8x128xf32>
    %cst_25 = arith.constant 0.333333343 : f32
    %97 = vector.broadcast %cst_25 : f32 to vector<8x128xf32>
    %98 = arith.mulf %97, %80 : vector<8x128xf32>
    %99 = arith.addf %96, %98 : vector<8x128xf32>
    %cst_26 = arith.constant 0.333333343 : f32
    %100 = vector.broadcast %cst_26 : f32 to vector<8x128xf32>
    %101 = arith.mulf %100, %94 : vector<8x128xf32>
    %102 = arith.addf %99, %101 : vector<8x128xf32>
    %103 = tpu.bitcast %60 : vector<8x128xf32> -> vector<8x128xi32>
    %c-2147483648_i32_27 = arith.constant -2147483648 : i32
    %104 = vector.broadcast %c-2147483648_i32_27 : i32 to vector<8x128xi32>
    %105 = arith.andi %103, %104 : vector<8x128xi32>
    %106 = tpu.bitcast %102 : vector<8x128xf32> -> vector<8x128xi32>
    %107 = arith.ori %106, %105 : vector<8x128xi32>
    %108 = tpu.bitcast %107 : vector<8x128xi32> -> vector<8x128xf32>
    %c2 = arith.constant 2 : index
    %c0_28 = arith.constant 0 : index
    %c0_29 = arith.constant 0 : index
    %109 = vector.load %arg4[%c2, %c0_28, %c0_29] : memref<4x8x128xf32, #tpu.memory_space<vmem>>, vector<1x8x128xf32>
    %110 = vector.shape_cast %109 : vector<1x8x128xf32> to vector<8x128xf32>
    %c0_30 = arith.constant 0 : index
    %c0_31 = arith.constant 0 : index
    %111 = vector.load %arg6[%c0_30, %c0_31] : memref<8x128xf32, #tpu.memory_space<vmem>>, vector<8x128xf32>
    %112 = arith.truncf %108 : vector<8x128xf32> to vector<8x128xbf16>
    %c0_32 = arith.constant 0 : index
    %c0_33 = arith.constant 0 : index
    %113 = vector.load %arg3[%c0_32, %c0_33] : memref<128x128xbf16, #tpu.memory_space<vmem>>, vector<128x128xbf16>
    %cst_34 = arith.constant dense<0.000000e+00> : vector<8x128xf32>
    %114 = tpu.matmul %112, %113, %cst_34 {dimension_numbers = #tpu.dot_dimension_numbers<[1], [0], [0], [1], [0, 0, 1, 1], [], []>} : vector<8x128xbf16>, vector<128x128xbf16>, vector<8x128xf32> -> vector<8x128xf32>
    %115 = arith.addf %111, %114 : vector<8x128xf32>
    %116 = vector.extract_strided_slice %110 {offsets = [0, 0], sizes = [1, 128], strides = [1, 1]} : vector<8x128xf32> to vector<1x128xf32>
    %117 = vector.extract_strided_slice %110 {offsets = [1, 0], sizes = [1, 128], strides = [1, 1]} : vector<8x128xf32> to vector<1x128xf32>
    %118 = vector.extract_strided_slice %110 {offsets = [2, 0], sizes = [1, 128], strides = [1, 1]} : vector<8x128xf32> to vector<1x128xf32>
    %119 = vector.extract_strided_slice %110 {offsets = [3, 0], sizes = [1, 128], strides = [1, 1]} : vector<8x128xf32> to vector<1x128xf32>
    %120 = vector.extract_strided_slice %110 {offsets = [4, 0], sizes = [1, 128], strides = [1, 1]} : vector<8x128xf32> to vector<1x128xf32>
    %121 = vector.extract_strided_slice %110 {offsets = [5, 0], sizes = [1, 128], strides = [1, 1]} : vector<8x128xf32> to vector<1x128xf32>
    %122 = vector.extract_strided_slice %110 {offsets = [6, 0], sizes = [1, 128], strides = [1, 1]} : vector<8x128xf32> to vector<1x128xf32>
    %123 = vector.extract_strided_slice %110 {offsets = [7, 0], sizes = [1, 128], strides = [1, 1]} : vector<8x128xf32> to vector<1x128xf32>
    %124 = math.absf %115 : vector<8x128xf32>
    %125 = vector.broadcast %116 : vector<1x128xf32> to vector<8x128xf32>
    %126 = arith.subf %124, %125 : vector<8x128xf32>
    %cst_35 = arith.constant 0.000000e+00 : f32
    %127 = vector.broadcast %cst_35 : f32 to vector<8x128xf32>
    %128 = arith.maximumf %126, %127 : vector<8x128xf32>
    %129 = vector.broadcast %117 : vector<1x128xf32> to vector<8x128xf32>
    %130 = arith.subf %124, %129 : vector<8x128xf32>
    %131 = vector.broadcast %118 : vector<1x128xf32> to vector<8x128xf32>
    %132 = arith.mulf %131, %130 : vector<8x128xf32>
    %cst_36 = arith.constant 0.000000e+00 : f32
    %133 = vector.broadcast %cst_36 : f32 to vector<8x128xf32>
    %134 = arith.maximumf %132, %133 : vector<8x128xf32>
    %135 = arith.minimumf %124, %134 : vector<8x128xf32>
    %136 = vector.broadcast %120 : vector<1x128xf32> to vector<8x128xf32>
    %137 = arith.cmpf ole, %124, %136 : vector<8x128xf32>
    %138 = vector.broadcast %119 : vector<1x128xf32> to vector<8x128xf32>
    %139 = arith.subf %124, %138 : vector<8x128xf32>
    %cst_37 = arith.constant 0.000000e+00 : f32
    %140 = vector.broadcast %cst_37 : f32 to vector<8x128xf32>
    %141 = arith.maximumf %139, %140 : vector<8x128xf32>
    %142 = vector.broadcast %121 : vector<1x128xf32> to vector<8x128xf32>
    %143 = arith.cmpf ole, %124, %142 : vector<8x128xf32>
    %144 = vector.broadcast %122 : vector<1x128xf32> to vector<8x128xf32>
    %145 = arith.mulf %144, %124 : vector<8x128xf32>
    %146 = vector.broadcast %123 : vector<1x128xf32> to vector<8x128xf32>
    %147 = arith.subf %145, %146 : vector<8x128xf32>
    %148 = arith.select %143, %147, %124 : vector<8x128xi1>, vector<8x128xf32>
    %149 = arith.select %137, %141, %148 : vector<8x128xi1>, vector<8x128xf32>
    %cst_38 = arith.constant 0.333333343 : f32
    %150 = vector.broadcast %cst_38 : f32 to vector<8x128xf32>
    %151 = arith.mulf %150, %128 : vector<8x128xf32>
    %cst_39 = arith.constant 0.333333343 : f32
    %152 = vector.broadcast %cst_39 : f32 to vector<8x128xf32>
    %153 = arith.mulf %152, %135 : vector<8x128xf32>
    %154 = arith.addf %151, %153 : vector<8x128xf32>
    %cst_40 = arith.constant 0.333333343 : f32
    %155 = vector.broadcast %cst_40 : f32 to vector<8x128xf32>
    %156 = arith.mulf %155, %149 : vector<8x128xf32>
    %157 = arith.addf %154, %156 : vector<8x128xf32>
    %158 = tpu.bitcast %115 : vector<8x128xf32> -> vector<8x128xi32>
    %c-2147483648_i32_41 = arith.constant -2147483648 : i32
    %159 = vector.broadcast %c-2147483648_i32_41 : i32 to vector<8x128xi32>
    %160 = arith.andi %158, %159 : vector<8x128xi32>
    %161 = tpu.bitcast %157 : vector<8x128xf32> -> vector<8x128xi32>
    %162 = arith.ori %161, %160 : vector<8x128xi32>
    %163 = tpu.bitcast %162 : vector<8x128xi32> -> vector<8x128xf32>
    %c3 = arith.constant 3 : index
    %c0_42 = arith.constant 0 : index
    %c0_43 = arith.constant 0 : index
    %164 = vector.load %arg4[%c3, %c0_42, %c0_43] : memref<4x8x128xf32, #tpu.memory_space<vmem>>, vector<1x8x128xf32>
    %165 = vector.shape_cast %164 : vector<1x8x128xf32> to vector<8x128xf32>
    %c0_44 = arith.constant 0 : index
    %c0_45 = arith.constant 0 : index
    %166 = vector.load %arg6[%c0_44, %c0_45] : memref<8x128xf32, #tpu.memory_space<vmem>>, vector<8x128xf32>
    %167 = arith.truncf %163 : vector<8x128xf32> to vector<8x128xbf16>
    %c0_46 = arith.constant 0 : index
    %c0_47 = arith.constant 0 : index
    %168 = vector.load %arg3[%c0_46, %c0_47] : memref<128x128xbf16, #tpu.memory_space<vmem>>, vector<128x128xbf16>
    %cst_48 = arith.constant dense<0.000000e+00> : vector<8x128xf32>
    %169 = tpu.matmul %167, %168, %cst_48 {dimension_numbers = #tpu.dot_dimension_numbers<[1], [0], [0], [1], [0, 0, 1, 1], [], []>} : vector<8x128xbf16>, vector<128x128xbf16>, vector<8x128xf32> -> vector<8x128xf32>
    %170 = arith.addf %166, %169 : vector<8x128xf32>
    %171 = vector.extract_strided_slice %165 {offsets = [0, 0], sizes = [1, 128], strides = [1, 1]} : vector<8x128xf32> to vector<1x128xf32>
    %172 = vector.extract_strided_slice %165 {offsets = [1, 0], sizes = [1, 128], strides = [1, 1]} : vector<8x128xf32> to vector<1x128xf32>
    %173 = vector.extract_strided_slice %165 {offsets = [2, 0], sizes = [1, 128], strides = [1, 1]} : vector<8x128xf32> to vector<1x128xf32>
    %174 = vector.extract_strided_slice %165 {offsets = [3, 0], sizes = [1, 128], strides = [1, 1]} : vector<8x128xf32> to vector<1x128xf32>
    %175 = vector.extract_strided_slice %165 {offsets = [4, 0], sizes = [1, 128], strides = [1, 1]} : vector<8x128xf32> to vector<1x128xf32>
    %176 = vector.extract_strided_slice %165 {offsets = [5, 0], sizes = [1, 128], strides = [1, 1]} : vector<8x128xf32> to vector<1x128xf32>
    %177 = vector.extract_strided_slice %165 {offsets = [6, 0], sizes = [1, 128], strides = [1, 1]} : vector<8x128xf32> to vector<1x128xf32>
    %178 = vector.extract_strided_slice %165 {offsets = [7, 0], sizes = [1, 128], strides = [1, 1]} : vector<8x128xf32> to vector<1x128xf32>
    %179 = math.absf %170 : vector<8x128xf32>
    %180 = vector.broadcast %171 : vector<1x128xf32> to vector<8x128xf32>
    %181 = arith.subf %179, %180 : vector<8x128xf32>
    %cst_49 = arith.constant 0.000000e+00 : f32
    %182 = vector.broadcast %cst_49 : f32 to vector<8x128xf32>
    %183 = arith.maximumf %181, %182 : vector<8x128xf32>
    %184 = vector.broadcast %172 : vector<1x128xf32> to vector<8x128xf32>
    %185 = arith.subf %179, %184 : vector<8x128xf32>
    %186 = vector.broadcast %173 : vector<1x128xf32> to vector<8x128xf32>
    %187 = arith.mulf %186, %185 : vector<8x128xf32>
    %cst_50 = arith.constant 0.000000e+00 : f32
    %188 = vector.broadcast %cst_50 : f32 to vector<8x128xf32>
    %189 = arith.maximumf %187, %188 : vector<8x128xf32>
    %190 = arith.minimumf %179, %189 : vector<8x128xf32>
    %191 = vector.broadcast %175 : vector<1x128xf32> to vector<8x128xf32>
    %192 = arith.cmpf ole, %179, %191 : vector<8x128xf32>
    %193 = vector.broadcast %174 : vector<1x128xf32> to vector<8x128xf32>
    %194 = arith.subf %179, %193 : vector<8x128xf32>
    %cst_51 = arith.constant 0.000000e+00 : f32
    %195 = vector.broadcast %cst_51 : f32 to vector<8x128xf32>
    %196 = arith.maximumf %194, %195 : vector<8x128xf32>
    %197 = vector.broadcast %176 : vector<1x128xf32> to vector<8x128xf32>
    %198 = arith.cmpf ole, %179, %197 : vector<8x128xf32>
    %199 = vector.broadcast %177 : vector<1x128xf32> to vector<8x128xf32>
    %200 = arith.mulf %199, %179 : vector<8x128xf32>
    %201 = vector.broadcast %178 : vector<1x128xf32> to vector<8x128xf32>
    %202 = arith.subf %200, %201 : vector<8x128xf32>
    %203 = arith.select %198, %202, %179 : vector<8x128xi1>, vector<8x128xf32>
    %204 = arith.select %192, %196, %203 : vector<8x128xi1>, vector<8x128xf32>
    %cst_52 = arith.constant 0.333333343 : f32
    %205 = vector.broadcast %cst_52 : f32 to vector<8x128xf32>
    %206 = arith.mulf %205, %183 : vector<8x128xf32>
    %cst_53 = arith.constant 0.333333343 : f32
    %207 = vector.broadcast %cst_53 : f32 to vector<8x128xf32>
    %208 = arith.mulf %207, %190 : vector<8x128xf32>
    %209 = arith.addf %206, %208 : vector<8x128xf32>
    %cst_54 = arith.constant 0.333333343 : f32
    %210 = vector.broadcast %cst_54 : f32 to vector<8x128xf32>
    %211 = arith.mulf %210, %204 : vector<8x128xf32>
    %212 = arith.addf %209, %211 : vector<8x128xf32>
    %213 = tpu.bitcast %170 : vector<8x128xf32> -> vector<8x128xi32>
    %c-2147483648_i32_55 = arith.constant -2147483648 : i32
    %214 = vector.broadcast %c-2147483648_i32_55 : i32 to vector<8x128xi32>
    %215 = arith.andi %213, %214 : vector<8x128xi32>
    %216 = tpu.bitcast %212 : vector<8x128xf32> -> vector<8x128xi32>
    %217 = arith.ori %216, %215 : vector<8x128xi32>
    %218 = tpu.bitcast %217 : vector<8x128xi32> -> vector<8x128xf32>
    %c0_56 = arith.constant 0 : index
    %c0_57 = arith.constant 0 : index
    %219 = vector.load %arg5[%c0_56, %c0_57] : memref<8x128xf32, #tpu.memory_space<vmem>>, vector<8x128xf32>
    tpu.vector_store %arg5[%c0_56, %c0_57], %218 {strides = array<i32>} : memref<8x128xf32, #tpu.memory_space<vmem>>, vector<8x128xf32>,
    return
  }
  func.func @transform_0(%arg0: i32) -> (i32, i32) {
    %c0_i32 = arith.constant 0 : i32
    %c0_i32_0 = arith.constant 0 : i32
    return %arg0, %c0_i32 : i32, i32
  }
  func.func @transform_1(%arg0: i32) -> (i32, i32) {
    %c0_i32 = arith.constant 0 : i32
    %c0_i32_0 = arith.constant 0 : i32
    %c0_i32_1 = arith.constant 0 : i32
    return %c0_i32, %c0_i32_0 : i32, i32
  }
  func.func @transform_2(%arg0: i32) -> (i32, i32) {
    %c0_i32 = arith.constant 0 : i32
    %c0_i32_0 = arith.constant 0 : i32
    %c0_i32_1 = arith.constant 0 : i32
    return %c0_i32, %c0_i32_0 : i32, i32
  }
  func.func @transform_3(%arg0: i32) -> (i32, i32, i32) {
    %c0_i32 = arith.constant 0 : i32
    %c0_i32_0 = arith.constant 0 : i32
    %c0_i32_1 = arith.constant 0 : i32
    %c0_i32_2 = arith.constant 0 : i32
    return %c0_i32, %c0_i32_0, %c0_i32_1 : i32, i32, i32
  }
  func.func @transform_4(%arg0: i32) -> (i32, i32) {
    %c0_i32 = arith.constant 0 : i32
    %c0_i32_0 = arith.constant 0 : i32
    return %arg0, %c0_i32 : i32, i32
  }
}

module attributes {stable_mosaic.version = 11 : i64} {
  func.func @_nuspan1_kernel(%arg0: i32, %arg1: memref<8x128xbf16, #tpu.memory_space<vmem>>, %arg2: memref<128x128xbf16, #tpu.memory_space<vmem>>, %arg3: memref<128x128xbf16, #tpu.memory_space<vmem>>, %arg4: memref<4x8x128xf32, #tpu.memory_space<vmem>>, %arg5: memref<8x128xf32, #tpu.memory_space<vmem>>, %arg6: memref<8x128xf32, #tpu.memory_space<vmem>>) attributes {dimension_semantics = [#tpu.dimension_semantics<parallel>], iteration_bounds = array<i64: 1>, scalar_prefetch = 0 : i64, scratch_operands = 1 : i64, tpu.core_type = #tpu.core_type<tc>, window_params = [{transform_indices = @transform_0, window_bounds = array<i64: 8, 128>}, {pipeline_mode = #tpu.pipeline_mode<synchronous>, transform_indices = @transform_1, window_bounds = array<i64: 128, 128>}, {pipeline_mode = #tpu.pipeline_mode<synchronous>, transform_indices = @transform_2, window_bounds = array<i64: 128, 128>}, {pipeline_mode = #tpu.pipeline_mode<synchronous>, transform_indices = @transform_3, window_bounds = array<i64: 4, 8, 128>}, {transform_indices = @transform_4, window_bounds = array<i64: 8, 128>}]} {
    %c0 = arith.constant 0 : index
    %c0_0 = arith.constant 0 : index
    %0 = vector.load %arg1[%c0, %c0_0] : memref<8x128xbf16, #tpu.memory_space<vmem>>, vector<8x128xbf16>
    %c0_1 = arith.constant 0 : index
    %c0_2 = arith.constant 0 : index
    %1 = vector.load %arg2[%c0_1, %c0_2] : memref<128x128xbf16, #tpu.memory_space<vmem>>, vector<128x128xbf16>
    %cst = arith.constant dense<0.000000e+00> : vector<8x128xf32>
    %2 = tpu.matmul %0, %1, %cst {dimension_numbers = #tpu.dot_dimension_numbers<[1], [0], [0], [1], [0, 0, 1, 1], [], []>} : vector<8x128xbf16>, vector<128x128xbf16>, vector<8x128xf32> -> vector<8x128xf32>
    %c0_3 = arith.constant 0 : index
    %c0_4 = arith.constant 0 : index
    %3 = vector.load %arg6[%c0_3, %c0_4] : memref<8x128xf32, #tpu.memory_space<vmem>>, vector<8x128xf32>
    tpu.vector_store %arg6[%c0_3, %c0_4], %2 {strides = array<i32>} : memref<8x128xf32, #tpu.memory_space<vmem>>, vector<8x128xf32>,
    %c0_5 = arith.constant 0 : index
    %c0_6 = arith.constant 0 : index
    %c0_7 = arith.constant 0 : index
    %4 = vector.load %arg4[%c0_5, %c0_6, %c0_7] : memref<4x8x128xf32, #tpu.memory_space<vmem>>, vector<1x8x128xf32>
    %5 = vector.shape_cast %4 : vector<1x8x128xf32> to vector<8x128xf32>
    %6 = vector.extract_strided_slice %5 {offsets = [0, 0], sizes = [1, 128], strides = [1, 1]} : vector<8x128xf32> to vector<1x128xf32>
    %7 = vector.extract_strided_slice %5 {offsets = [1, 0], sizes = [1, 128], strides = [1, 1]} : vector<8x128xf32> to vector<1x128xf32>
    %8 = vector.extract_strided_slice %5 {offsets = [2, 0], sizes = [1, 128], strides = [1, 1]} : vector<8x128xf32> to vector<1x128xf32>
    %9 = vector.extract_strided_slice %5 {offsets = [3, 0], sizes = [1, 128], strides = [1, 1]} : vector<8x128xf32> to vector<1x128xf32>
    %10 = vector.extract_strided_slice %5 {offsets = [4, 0], sizes = [1, 128], strides = [1, 1]} : vector<8x128xf32> to vector<1x128xf32>
    %11 = vector.extract_strided_slice %5 {offsets = [5, 0], sizes = [1, 128], strides = [1, 1]} : vector<8x128xf32> to vector<1x128xf32>
    %12 = vector.extract_strided_slice %5 {offsets = [6, 0], sizes = [1, 128], strides = [1, 1]} : vector<8x128xf32> to vector<1x128xf32>
    %13 = vector.extract_strided_slice %5 {offsets = [7, 0], sizes = [1, 128], strides = [1, 1]} : vector<8x128xf32> to vector<1x128xf32>
    %14 = math.absf %2 : vector<8x128xf32>
    %15 = vector.broadcast %6 : vector<1x128xf32> to vector<8x128xf32>
    %16 = arith.subf %14, %15 : vector<8x128xf32>
    %cst_8 = arith.constant 0.000000e+00 : f32
    %17 = vector.broadcast %cst_8 : f32 to vector<8x128xf32>
    %18 = arith.maximumf %16, %17 : vector<8x128xf32>
    %19 = vector.broadcast %7 : vector<1x128xf32> to vector<8x128xf32>
    %20 = arith.subf %14, %19 : vector<8x128xf32>
    %21 = vector.broadcast %8 : vector<1x128xf32> to vector<8x128xf32>
    %22 = arith.mulf %21, %20 : vector<8x128xf32>
    %cst_9 = arith.constant 0.000000e+00 : f32
    %23 = vector.broadcast %cst_9 : f32 to vector<8x128xf32>
    %24 = arith.maximumf %22, %23 : vector<8x128xf32>
    %25 = arith.minimumf %14, %24 : vector<8x128xf32>
    %26 = vector.broadcast %10 : vector<1x128xf32> to vector<8x128xf32>
    %27 = arith.cmpf ole, %14, %26 : vector<8x128xf32>
    %28 = vector.broadcast %9 : vector<1x128xf32> to vector<8x128xf32>
    %29 = arith.subf %14, %28 : vector<8x128xf32>
    %cst_10 = arith.constant 0.000000e+00 : f32
    %30 = vector.broadcast %cst_10 : f32 to vector<8x128xf32>
    %31 = arith.maximumf %29, %30 : vector<8x128xf32>
    %32 = vector.broadcast %11 : vector<1x128xf32> to vector<8x128xf32>
    %33 = arith.cmpf ole, %14, %32 : vector<8x128xf32>
    %34 = vector.broadcast %12 : vector<1x128xf32> to vector<8x128xf32>
    %35 = arith.mulf %34, %14 : vector<8x128xf32>
    %36 = vector.broadcast %13 : vector<1x128xf32> to vector<8x128xf32>
    %37 = arith.subf %35, %36 : vector<8x128xf32>
    %38 = arith.select %33, %37, %14 : vector<8x128xi1>, vector<8x128xf32>
    %39 = arith.select %27, %31, %38 : vector<8x128xi1>, vector<8x128xf32>
    %cst_11 = arith.constant 0.333333343 : f32
    %40 = vector.broadcast %cst_11 : f32 to vector<8x128xf32>
    %41 = arith.mulf %40, %18 : vector<8x128xf32>
    %cst_12 = arith.constant 0.333333343 : f32
    %42 = vector.broadcast %cst_12 : f32 to vector<8x128xf32>
    %43 = arith.mulf %42, %25 : vector<8x128xf32>
    %44 = arith.addf %41, %43 : vector<8x128xf32>
    %cst_13 = arith.constant 0.333333343 : f32
    %45 = vector.broadcast %cst_13 : f32 to vector<8x128xf32>
    %46 = arith.mulf %45, %39 : vector<8x128xf32>
    %47 = arith.addf %44, %46 : vector<8x128xf32>
    %48 = tpu.bitcast %2 : vector<8x128xf32> -> vector<8x128xi32>
    %c-2147483648_i32 = arith.constant -2147483648 : i32
    %49 = vector.broadcast %c-2147483648_i32 : i32 to vector<8x128xi32>
    %50 = arith.andi %48, %49 : vector<8x128xi32>
    %51 = tpu.bitcast %47 : vector<8x128xf32> -> vector<8x128xi32>
    %52 = arith.ori %51, %50 : vector<8x128xi32>
    %53 = tpu.bitcast %52 : vector<8x128xi32> -> vector<8x128xf32>
    %c1 = arith.constant 1 : index
    %c0_14 = arith.constant 0 : index
    %c0_15 = arith.constant 0 : index
    %54 = vector.load %arg4[%c1, %c0_14, %c0_15] : memref<4x8x128xf32, #tpu.memory_space<vmem>>, vector<1x8x128xf32>
    %55 = vector.shape_cast %54 : vector<1x8x128xf32> to vector<8x128xf32>
    %c0_16 = arith.constant 0 : index
    %c0_17 = arith.constant 0 : index
    %56 = vector.load %arg6[%c0_16, %c0_17] : memref<8x128xf32, #tpu.memory_space<vmem>>, vector<8x128xf32>
    %57 = arith.truncf %53 : vector<8x128xf32> to vector<8x128xbf16>
    %c0_18 = arith.constant 0 : index
    %c0_19 = arith.constant 0 : index
    %58 = vector.load %arg3[%c0_18, %c0_19] : memref<128x128xbf16, #tpu.memory_space<vmem>>, vector<128x128xbf16>
    %cst_20 = arith.constant dense<0.000000e+00> : vector<8x128xf32>
    %59 = tpu.matmul %57, %58, %cst_20 {dimension_numbers = #tpu.dot_dimension_numbers<[1], [0], [0], [1], [0, 0, 1, 1], [], []>} : vector<8x128xbf16>, vector<128x128xbf16>, vector<8x128xf32> -> vector<8x128xf32>
    %60 = arith.addf %56, %59 : vector<8x128xf32>
    %61 = vector.extract_strided_slice %55 {offsets = [0, 0], sizes = [1, 128], strides = [1, 1]} : vector<8x128xf32> to vector<1x128xf32>
    %62 = vector.extract_strided_slice %55 {offsets = [1, 0], sizes = [1, 128], strides = [1, 1]} : vector<8x128xf32> to vector<1x128xf32>
    %63 = vector.extract_strided_slice %55 {offsets = [2, 0], sizes = [1, 128], strides = [1, 1]} : vector<8x128xf32> to vector<1x128xf32>
    %64 = vector.extract_strided_slice %55 {offsets = [3, 0], sizes = [1, 128], strides = [1, 1]} : vector<8x128xf32> to vector<1x128xf32>
    %65 = vector.extract_strided_slice %55 {offsets = [4, 0], sizes = [1, 128], strides = [1, 1]} : vector<8x128xf32> to vector<1x128xf32>
    %66 = vector.extract_strided_slice %55 {offsets = [5, 0], sizes = [1, 128], strides = [1, 1]} : vector<8x128xf32> to vector<1x128xf32>
    %67 = vector.extract_strided_slice %55 {offsets = [6, 0], sizes = [1, 128], strides = [1, 1]} : vector<8x128xf32> to vector<1x128xf32>
    %68 = vector.extract_strided_slice %55 {offsets = [7, 0], sizes = [1, 128], strides = [1, 1]} : vector<8x128xf32> to vector<1x128xf32>
    %69 = math.absf %60 : vector<8x128xf32>
    %70 = vector.broadcast %61 : vector<1x128xf32> to vector<8x128xf32>
    %71 = arith.subf %69, %70 : vector<8x128xf32>
    %cst_21 = arith.constant 0.000000e+00 : f32
    %72 = vector.broadcast %cst_21 : f32 to vector<8x128xf32>
    %73 = arith.maximumf %71, %72 : vector<8x128xf32>
    %74 = vector.broadcast %62 : vector<1x128xf32> to vector<8x128xf32>
    %75 = arith.subf %69, %74 : vector<8x128xf32>
    %76 = vector.broadcast %63 : vector<1x128xf32> to vector<8x128xf32>
    %77 = arith.mulf %76, %75 : vector<8x128xf32>
    %cst_22 = arith.constant 0.000000e+00 : f32
    %78 = vector.broadcast %cst_22 : f32 to vector<8x128xf32>
    %79 = arith.maximumf %77, %78 : vector<8x128xf32>
    %80 = arith.minimumf %69, %79 : vector<8x128xf32>
    %81 = vector.broadcast %65 : vector<1x128xf32> to vector<8x128xf32>
    %82 = arith.cmpf ole, %69, %81 : vector<8x128xf32>
    %83 = vector.broadcast %64 : vector<1x128xf32> to vector<8x128xf32>
    %84 = arith.subf %69, %83 : vector<8x128xf32>
    %cst_23 = arith.constant 0.000000e+00 : f32
    %85 = vector.broadcast %cst_23 : f32 to vector<8x128xf32>
    %86 = arith.maximumf %84, %85 : vector<8x128xf32>
    %87 = vector.broadcast %66 : vector<1x128xf32> to vector<8x128xf32>
    %88 = arith.cmpf ole, %69, %87 : vector<8x128xf32>
    %89 = vector.broadcast %67 : vector<1x128xf32> to vector<8x128xf32>
    %90 = arith.mulf %89, %69 : vector<8x128xf32>
    %91 = vector.broadcast %68 : vector<1x128xf32> to vector<8x128xf32>
    %92 = arith.subf %90, %91 : vector<8x128xf32>
    %93 = arith.select %88, %92, %69 : vector<8x128xi1>, vector<8x128xf32>
    %94 = arith.select %82, %86, %93 : vector<8x128xi1>, vector<8x128xf32>
    %cst_24 = arith.constant 0.333333343 : f32
    %95 = vector.broadcast %cst_24 : f32 to vector<8x128xf32>
    %96 = arith.mulf %95, %73 : vector<8x128xf32>
    %cst_25 = arith.constant 0.333333343 : f32
    %97 = vector.broadcast %cst_25 : f32 to vector<8x128xf32>
    %98 = arith.mulf %97, %80 : vector<8x128xf32>
    %99 = arith.addf %96, %98 : vector<8x128xf32>
    %cst_26 = arith.constant 0.333333343 : f32
    %100 = vector.broadcast %cst_26 : f32 to vector<8x128xf32>
    %101 = arith.mulf %100, %94 : vector<8x128xf32>
    %102 = arith.addf %99, %101 : vector<8x128xf32>
    %103 = tpu.bitcast %60 : vector<8x128xf32> -> vector<8x128xi32>
    %c-2147483648_i32_27 = arith.constant -2147483648 : i32
    %104 = vector.broadcast %c-2147483648_i32_27 : i32 to vector<8x128xi32>
    %105 = arith.andi %103, %104 : vector<8x128xi32>
    %106 = tpu.bitcast %102 : vector<8x128xf32> -> vector<8x128xi32>
    %107 = arith.ori %106, %105 : vector<8x128xi32>
    %108 = tpu.bitcast %107 : vector<8x128xi32> -> vector<8x128xf32>
    %c2 = arith.constant 2 : index
    %c0_28 = arith.constant 0 : index
    %c0_29 = arith.constant 0 : index
    %109 = vector.load %arg4[%c2, %c0_28, %c0_29] : memref<4x8x128xf32, #tpu.memory_space<vmem>>, vector<1x8x128xf32>
    %110 = vector.shape_cast %109 : vector<1x8x128xf32> to vector<8x128xf32>
    %c0_30 = arith.constant 0 : index
    %c0_31 = arith.constant 0 : index
    %111 = vector.load %arg6[%c0_30, %c0_31] : memref<8x128xf32, #tpu.memory_space<vmem>>, vector<8x128xf32>
    %112 = arith.truncf %108 : vector<8x128xf32> to vector<8x128xbf16>
    %c0_32 = arith.constant 0 : index
    %c0_33 = arith.constant 0 : index
    %113 = vector.load %arg3[%c0_32, %c0_33] : memref<128x128xbf16, #tpu.memory_space<vmem>>, vector<128x128xbf16>
    %cst_34 = arith.constant dense<0.000000e+00> : vector<8x128xf32>
    %114 = tpu.matmul %112, %113, %cst_34 {dimension_numbers = #tpu.dot_dimension_numbers<[1], [0], [0], [1], [0, 0, 1, 1], [], []>} : vector<8x128xbf16>, vector<128x128xbf16>, vector<8x128xf32> -> vector<8x128xf32>
    %115 = arith.addf %111, %114 : vector<8x128xf32>
    %116 = vector.extract_strided_slice %110 {offsets = [0, 0], sizes = [1, 128], strides = [1, 1]} : vector<8x128xf32> to vector<1x128xf32>
    %117 = vector.extract_strided_slice %110 {offsets = [1, 0], sizes = [1, 128], strides = [1, 1]} : vector<8x128xf32> to vector<1x128xf32>
    %118 = vector.extract_strided_slice %110 {offsets = [2, 0], sizes = [1, 128], strides = [1, 1]} : vector<8x128xf32> to vector<1x128xf32>
    %119 = vector.extract_strided_slice %110 {offsets = [3, 0], sizes = [1, 128], strides = [1, 1]} : vector<8x128xf32> to vector<1x128xf32>
    %120 = vector.extract_strided_slice %110 {offsets = [4, 0], sizes = [1, 128], strides = [1, 1]} : vector<8x128xf32> to vector<1x128xf32>
    %121 = vector.extract_strided_slice %110 {offsets = [5, 0], sizes = [1, 128], strides = [1, 1]} : vector<8x128xf32> to vector<1x128xf32>
    %122 = vector.extract_strided_slice %110 {offsets = [6, 0], sizes = [1, 128], strides = [1, 1]} : vector<8x128xf32> to vector<1x128xf32>
    %123 = vector.extract_strided_slice %110 {offsets = [7, 0], sizes = [1, 128], strides = [1, 1]} : vector<8x128xf32> to vector<1x128xf32>
    %124 = math.absf %115 : vector<8x128xf32>
    %125 = vector.broadcast %116 : vector<1x128xf32> to vector<8x128xf32>
    %126 = arith.subf %124, %125 : vector<8x128xf32>
    %cst_35 = arith.constant 0.000000e+00 : f32
    %127 = vector.broadcast %cst_35 : f32 to vector<8x128xf32>
    %128 = arith.maximumf %126, %127 : vector<8x128xf32>
    %129 = vector.broadcast %117 : vector<1x128xf32> to vector<8x128xf32>
    %130 = arith.subf %124, %129 : vector<8x128xf32>
    %131 = vector.broadcast %118 : vector<1x128xf32> to vector<8x128xf32>
    %132 = arith.mulf %131, %130 : vector<8x128xf32>
    %cst_36 = arith.constant 0.000000e+00 : f32
    %133 = vector.broadcast %cst_36 : f32 to vector<8x128xf32>
    %134 = arith.maximumf %132, %133 : vector<8x128xf32>
    %135 = arith.minimumf %124, %134 : vector<8x128xf32>
    %136 = vector.broadcast %120 : vector<1x128xf32> to vector<8x128xf32>
    %137 = arith.cmpf ole, %124, %136 : vector<8x128xf32>
    %138 = vector.broadcast %119 : vector<1x128xf32> to vector<8x128xf32>
    %139 = arith.subf %124, %138 : vector<8x128xf32>
    %cst_37 = arith.constant 0.000000e+00 : f32
    %140 = vector.broadcast %cst_37 : f32 to vector<8x128xf32>
    %141 = arith.maximumf %139, %140 : vector<8x128xf32>
    %142 = vector.broadcast %121 : vector<1x128xf32> to vector<8x128xf32>
    %143 = arith.cmpf ole, %124, %142 : vector<8x128xf32>
    %144 = vector.broadcast %122 : vector<1x128xf32> to vector<8x128xf32>
    %145 = arith.mulf %144, %124 : vector<8x128xf32>
    %146 = vector.broadcast %123 : vector<1x128xf32> to vector<8x128xf32>
    %147 = arith.subf %145, %146 : vector<8x128xf32>
    %148 = arith.select %143, %147, %124 : vector<8x128xi1>, vector<8x128xf32>
    %149 = arith.select %137, %141, %148 : vector<8x128xi1>, vector<8x128xf32>
    %cst_38 = arith.constant 0.333333343 : f32
    %150 = vector.broadcast %cst_38 : f32 to vector<8x128xf32>
    %151 = arith.mulf %150, %128 : vector<8x128xf32>
    %cst_39 = arith.constant 0.333333343 : f32
    %152 = vector.broadcast %cst_39 : f32 to vector<8x128xf32>
    %153 = arith.mulf %152, %135 : vector<8x128xf32>
    %154 = arith.addf %151, %153 : vector<8x128xf32>
    %cst_40 = arith.constant 0.333333343 : f32
    %155 = vector.broadcast %cst_40 : f32 to vector<8x128xf32>
    %156 = arith.mulf %155, %149 : vector<8x128xf32>
    %157 = arith.addf %154, %156 : vector<8x128xf32>
    %158 = tpu.bitcast %115 : vector<8x128xf32> -> vector<8x128xi32>
    %c-2147483648_i32_41 = arith.constant -2147483648 : i32
    %159 = vector.broadcast %c-2147483648_i32_41 : i32 to vector<8x128xi32>
    %160 = arith.andi %158, %159 : vector<8x128xi32>
    %161 = tpu.bitcast %157 : vector<8x128xf32> -> vector<8x128xi32>
    %162 = arith.ori %161, %160 : vector<8x128xi32>
    %163 = tpu.bitcast %162 : vector<8x128xi32> -> vector<8x128xf32>
    %c3 = arith.constant 3 : index
    %c0_42 = arith.constant 0 : index
    %c0_43 = arith.constant 0 : index
    %164 = vector.load %arg4[%c3, %c0_42, %c0_43] : memref<4x8x128xf32, #tpu.memory_space<vmem>>, vector<1x8x128xf32>
    %165 = vector.shape_cast %164 : vector<1x8x128xf32> to vector<8x128xf32>
    %c0_44 = arith.constant 0 : index
    %c0_45 = arith.constant 0 : index
    %166 = vector.load %arg6[%c0_44, %c0_45] : memref<8x128xf32, #tpu.memory_space<vmem>>, vector<8x128xf32>
    %167 = arith.truncf %163 : vector<8x128xf32> to vector<8x128xbf16>
    %c0_46 = arith.constant 0 : index
    %c0_47 = arith.constant 0 : index
    %168 = vector.load %arg3[%c0_46, %c0_47] : memref<128x128xbf16, #tpu.memory_space<vmem>>, vector<128x128xbf16>
    %cst_48 = arith.constant dense<0.000000e+00> : vector<8x128xf32>
    %169 = tpu.matmul %167, %168, %cst_48 {dimension_numbers = #tpu.dot_dimension_numbers<[1], [0], [0], [1], [0, 0, 1, 1], [], []>} : vector<8x128xbf16>, vector<128x128xbf16>, vector<8x128xf32> -> vector<8x128xf32>
    %170 = arith.addf %166, %169 : vector<8x128xf32>
    %171 = vector.extract_strided_slice %165 {offsets = [0, 0], sizes = [1, 128], strides = [1, 1]} : vector<8x128xf32> to vector<1x128xf32>
    %172 = vector.extract_strided_slice %165 {offsets = [1, 0], sizes = [1, 128], strides = [1, 1]} : vector<8x128xf32> to vector<1x128xf32>
    %173 = vector.extract_strided_slice %165 {offsets = [2, 0], sizes = [1, 128], strides = [1, 1]} : vector<8x128xf32> to vector<1x128xf32>
    %174 = vector.extract_strided_slice %165 {offsets = [3, 0], sizes = [1, 128], strides = [1, 1]} : vector<8x128xf32> to vector<1x128xf32>
    %175 = vector.extract_strided_slice %165 {offsets = [4, 0], sizes = [1, 128], strides = [1, 1]} : vector<8x128xf32> to vector<1x128xf32>
    %176 = vector.extract_strided_slice %165 {offsets = [5, 0], sizes = [1, 128], strides = [1, 1]} : vector<8x128xf32> to vector<1x128xf32>
    %177 = vector.extract_strided_slice %165 {offsets = [6, 0], sizes = [1, 128], strides = [1, 1]} : vector<8x128xf32> to vector<1x128xf32>
    %178 = vector.extract_strided_slice %165 {offsets = [7, 0], sizes = [1, 128], strides = [1, 1]} : vector<8x128xf32> to vector<1x128xf32>
    %179 = math.absf %170 : vector<8x128xf32>
    %180 = vector.broadcast %171 : vector<1x128xf32> to vector<8x128xf32>
    %181 = arith.subf %179, %180 : vector<8x128xf32>
    %cst_49 = arith.constant 0.000000e+00 : f32
    %182 = vector.broadcast %cst_49 : f32 to vector<8x128xf32>
    %183 = arith.maximumf %181, %182 : vector<8x128xf32>
    %184 = vector.broadcast %172 : vector<1x128xf32> to vector<8x128xf32>
    %185 = arith.subf %179, %184 : vector<8x128xf32>
    %186 = vector.broadcast %173 : vector<1x128xf32> to vector<8x128xf32>
    %187 = arith.mulf %186, %185 : vector<8x128xf32>
    %cst_50 = arith.constant 0.000000e+00 : f32
    %188 = vector.broadcast %cst_50 : f32 to vector<8x128xf32>
    %189 = arith.maximumf %187, %188 : vector<8x128xf32>
    %190 = arith.minimumf %179, %189 : vector<8x128xf32>
    %191 = vector.broadcast %175 : vector<1x128xf32> to vector<8x128xf32>
    %192 = arith.cmpf ole, %179, %191 : vector<8x128xf32>
    %193 = vector.broadcast %174 : vector<1x128xf32> to vector<8x128xf32>
    %194 = arith.subf %179, %193 : vector<8x128xf32>
    %cst_51 = arith.constant 0.000000e+00 : f32
    %195 = vector.broadcast %cst_51 : f32 to vector<8x128xf32>
    %196 = arith.maximumf %194, %195 : vector<8x128xf32>
    %197 = vector.broadcast %176 : vector<1x128xf32> to vector<8x128xf32>
    %198 = arith.cmpf ole, %179, %197 : vector<8x128xf32>
    %199 = vector.broadcast %177 : vector<1x128xf32> to vector<8x128xf32>
    %200 = arith.mulf %199, %179 : vector<8x128xf32>
    %201 = vector.broadcast %178 : vector<1x128xf32> to vector<8x128xf32>
    %202 = arith.subf %200, %201 : vector<8x128xf32>
    %203 = arith.select %198, %202, %179 : vector<8x128xi1>, vector<8x128xf32>
    %204 = arith.select %192, %196, %203 : vector<8x128xi1>, vector<8x128xf32>
    %cst_52 = arith.constant 0.333333343 : f32
    %205 = vector.broadcast %cst_52 : f32 to vector<8x128xf32>
    %206 = arith.mulf %205, %183 : vector<8x128xf32>
    %cst_53 = arith.constant 0.333333343 : f32
    %207 = vector.broadcast %cst_53 : f32 to vector<8x128xf32>
    %208 = arith.mulf %207, %190 : vector<8x128xf32>
    %209 = arith.addf %206, %208 : vector<8x128xf32>
    %cst_54 = arith.constant 0.333333343 : f32
    %210 = vector.broadcast %cst_54 : f32 to vector<8x128xf32>
    %211 = arith.mulf %210, %204 : vector<8x128xf32>
    %212 = arith.addf %209, %211 : vector<8x128xf32>
    %213 = tpu.bitcast %170 : vector<8x128xf32> -> vector<8x128xi32>
    %c-2147483648_i32_55 = arith.constant -2147483648 : i32
    %214 = vector.broadcast %c-2147483648_i32_55 : i32 to vector<8x128xi32>
    %215 = arith.andi %213, %214 : vector<8x128xi32>
    %216 = tpu.bitcast %212 : vector<8x128xf32> -> vector<8x128xi32>
    %217 = arith.ori %216, %215 : vector<8x128xi32>
    %218 = tpu.bitcast %217 : vector<8x128xi32> -> vector<8x128xf32>
    %c0_56 = arith.constant 0 : index
    %c0_57 = arith.constant 0 : index
    %219 = vector.load %arg5[%c0_56, %c0_57] : memref<8x128xf32, #tpu.memory_space<vmem>>, vector<8x128xf32>
    tpu.vector_store %arg5[%c0_56, %c0_57], %218 {strides = array<i32>} : memref<8x128xf32, #tpu.memory_space<vmem>>, vector<8x128xf32>,
    return
  }
  func.func @transform_0(%arg0: i32) -> (i32, i32) {
    %c0_i32 = arith.constant 0 : i32
    %c0_i32_0 = arith.constant 0 : i32
    return %arg0, %c0_i32 : i32, i32
  }
  func.func @transform_1(%arg0: i32) -> (i32, i32) {
    %c0_i32 = arith.constant 0 : i32
    %c0_i32_0 = arith.constant 0 : i32
    %c0_i32_1 = arith.constant 0 : i32
    return %c0_i32, %c0_i32_0 : i32, i32
  }
  func.func @transform_2(%arg0: i32) -> (i32, i32) {
    %c0_i32 = arith.constant 0 : i32
    %c0_i32_0 = arith.constant 0 : i32
    %c0_i32_1 = arith.constant 0 : i32
    return %c0_i32, %c0_i32_0 : i32, i32
  }
  func.func @transform_3(%arg0: i32) -> (i32, i32, i32) {
    %c0_i32 = arith.constant 0 : i32
    %c0_i32_0 = arith.constant 0 : i32
    %c0_i32_1 = arith.constant 0 : i32
    %c0_i32_2 = arith.constant 0 : i32
    return %c0_i32, %c0_i32_0, %c0_i32_1 : i32, i32, i32
  }
  func.func @transform_4(%arg0: i32) -> (i32, i32) {
    %c0_i32 = arith.constant 0 : i32
    %c0_i32_0 = arith.constant 0 : i32
    return %arg0, %c0_i32 : i32, i32
  }
}

</mosaic_0001>

<bundles_post_ra>
// kernel: tpu_custom_call.1
= control target key start
LH: loop header
LB: loop body
LE: loop exit
PB: predicated region body
PF: predicated region fallthrough
CT: control target
= control target key end

     0   :  { %9 = vsyncpa [#allocation4], 0  ;;  %s1075_s0 = inlined_call_operand.hbm [shape: bf16[8,128], index: 0, kind: input, shape index: {}]   ;;  %s1076_s1 = inlined_call_operand.hbm [shape: bf16[128,128], index: 1, kind: input, shape index: {}]   ;;  %s1077_s2 = inlined_call_operand.hbm [shape: bf16[128,128], index: 2, kind: input, shape index: {}]   ;;  %s1078_s3 = inlined_call_operand.hbm [shape: f32[4,8,128], index: 3, kind: input, shape index: {}]   ;;  %s1079_s4 = inlined_call_operand.hbm [shape: f32[8,128], index: 4, kind: output, shape index: {}]  }
   0x1   :  { %10 = vsyncpa [#allocation7], 0 }
   0x2   :  { %11 = vsyncpa [#allocation10], 0 }
   0x3   :  { %12 = vsyncpa [#allocation5], 0  ;;  %s889_s15 = smov [#allocation6]  }
   0x4   :  { %s28_s16 = sshll.u32 %s889_s15, 4  ;;  %s29_s16 = int_to_ptr.vmem [resolvable:$true] %s28_s16 }
   0x5   :  { %s789_s17 = scalar_lea.vmem %s29_s16, 1024  ;;  %p794_p1 = scmp.lt.s32.totalorder %s29_s16, %s29_s16 }
   0x6   :  { %p790_p0 = scmp.ne.s32.totalorder %s29_s16, %s789_s17  ;;  %p795_p2 = scmp.lt.s32.totalorder %s789_s17, %s789_s17 }
   0x8   :  { %p796_p3 = por %p795_p2, %p794_p1 }
   0xa   :  { %p797_p4 = pnand %p796_p3, %p790_p0 }
   0xc   :  { %800 = shalt.err (!%p797_p4)
}
   0xd   :  { %s890_s18 = smov 64   ;;  %s891_s19 = smov 4  }
   0xe   :  { %34 = dma.hbm_to_vmem [thread:$0]  %s1076_s1, 1024, %s29_s16, [#allocation7], %s890_s18, %s890_s18, %s891_s19  }
   0xf   :  { %s892_s22 = smov [#allocation3]   ;;  %s893_s24 = smov [#allocation8]  }
  0x10   :  { %s19_s23 = sshll.u32 %s892_s22, 4  ;;  %s40_s25 = sshll.u32 %s893_s24, 4  ;;  %s20_s23 = int_to_ptr.vmem [resolvable:$true] %s19_s23  ;;  %s41_s25 = int_to_ptr.vmem [resolvable:$true] %s40_s25 }
  0x11   :  { %s809_s26 = scalar_lea.vmem %s20_s23, 64  ;;  %p814_p6 = scmp.lt.s32.totalorder %s20_s23, %s20_s23 }
  0x12   :  { %p810_p5 = scmp.ne.s32.totalorder %s20_s23, %s809_s26  ;;  %p815_p7 = scmp.lt.s32.totalorder %s809_s26, %s809_s26 }
  0x14   :  { %p816_p8 = por %p815_p7, %p814_p6 }
  0x16   :  { %p817_p9 = pnand %p816_p8, %p810_p5 }
  0x18   :  { %820 = shalt.err (!%p817_p9)
}
  0x19   :  { %22 = dma.hbm_to_vmem [thread:$0]  %s1075_s0, 64, %s20_s23, [#allocation4]  }
  0x1a   :  { %s829_s29 = scalar_lea.vmem %s41_s25, 1024  ;;  %p834_p11 = scmp.lt.s32.totalorder %s41_s25, %s41_s25 }
  0x1b   :  { %p830_p10 = scmp.ne.s32.totalorder %s41_s25, %s829_s29  ;;  %p835_p12 = scmp.lt.s32.totalorder %s829_s29, %s829_s29 }
  0x1d   :  { %p836_p13 = por %p835_p12, %p834_p11 }
  0x1f   :  { %p837_p0 = pnand %p836_p13, %p830_p10 }
  0x21   :  { %840 = shalt.err (!%p837_p0)
}
  0x22   :  { %46 = dma.hbm_to_vmem [thread:$0]  %s1077_s2, 1024, %s41_s25, [#allocation7], %s890_s18, %s890_s18, %s891_s19  }
  0x23   :  { %s894_s5 = smov [#allocation9]  }
  0x24   :  { %s52_s6 = sshll.u32 %s894_s5, 4  ;;  %s53_s6 = int_to_ptr.vmem [resolvable:$true] %s52_s6 }
  0x25   :  { %s849_s7 = scalar_lea.vmem %s53_s6, 512  ;;  %p854_p2 = scmp.lt.s32.totalorder %s53_s6, %s53_s6 }
  0x26   :  { %p850_p1 = scmp.ne.s32.totalorder %s53_s6, %s849_s7  ;;  %p855_p3 = scmp.lt.s32.totalorder %s849_s7, %s849_s7 }
  0x28   :  { %p856_p4 = por %p855_p3, %p854_p2 }
  0x2a   :  { %p857_p5 = pnand %p856_p4, %p850_p1 }
  0x2c   :  { %860 = shalt.err (!%p857_p5)
}
  0x2d   :  { %s895_s0 = smov 128   ;;  %s896_s8 = smov 8  }
  0x2e   :  { %58 = dma.hbm_to_vmem [thread:$0]  %s1078_s3, 512, %s53_s6, [#allocation10], %s895_s0, %s895_s0, %s896_s8  }
  0x2f   :  { %881 = dma.done.wait [#allocation4], 64  }
  0x30   :  { %882 = vsyncadd [#allocation4], 4294967232 }
  0x31   :  { %883 = dma.done.wait [#allocation7], 2048  }
  0x32   :  { %884 = vsyncadd [#allocation7], 4294965248 }
  0x33   :  { %885 = dma.done.wait [#allocation10], 512  }
  0x34   :  { %886 = vsyncadd [#allocation10], 4294966784  ;;  %v897_v0 = vmov 0.0   ;;  %vm898_vm0 = vmmov 0   ;;  %v765_v1 = vld [vmem:[#allocation6 + $0x38] sm:$0xff]   ;;  %v766_v2 = vld [vmem:[#allocation6 + $0x30] sm:$0xff]   ;;  %v180_v18 = vlaneseq }
  0x35   :  { %674 = vmatprep.subr.bf16.mxu0 %v897_v0  ;;  %690 = vmatprep.mubr.msk.bf16.mxu0 %vm898_vm0, %v897_v0  ;;  %v767_v3 = vld [vmem:[#allocation6 + $0x28] sm:$0xff]   ;;  %v945_v4 = vld [vmem:[#allocation8 + $0x38] sm:$0xff]   ;;  %v768_v5 = vld [vmem:[#allocation6 + $0x20] sm:$0xff]   ;;  %s899_s2 = smov [#allocation11]  }
  0x36   :  { %694 = vmatprep.subr.bf16.mxu1 %v897_v0  ;;  %710 = vmatprep.mubr.msk.bf16.mxu1 %vm898_vm0, %v897_v0  ;;  %v949_v6 = vld [vmem:[#allocation8 + $0x30] sm:$0xff]   ;;  %v769_v7 = vld [vmem:[#allocation6 + $0x18] sm:$0xff]   ;;  %v954_v8 = vld [vmem:[#allocation8 + $0x28] sm:$0xff]   ;;  %v181_v19 = vshrl.u32 %v180_v18, 7  ;;  %s611_s3 = sshll.u32 %s899_s2, 4  ;;  %s612_s3 = int_to_ptr.vmem [resolvable:$true] %s611_s3 }
  0x37   :  { %675 = vmatpush3.bf16.msra.mxu0 %v765_v1  ;;  %695 = vmatpush3.bf16.msra.mxu1 %v945_v4  ;;  %v770_v9 = vld [vmem:[#allocation6 + $0x10] sm:$0xff]   ;;  %v771_v10 = vld [vmem:[#allocation6 + $0x8] sm:$0xff]   ;;  %v772_v11 = vld [vmem:[#allocation6] sm:$0xff]   ;;  %s861_s11 = scalar_lea.vmem %s612_s3, 128  ;;  %p866_p7 = scmp.lt.s32.totalorder %s612_s3, %s612_s3 }
  0x38   :  { %676 = vmatprep.subr.bf16.mxu0 %v897_v0  ;;  %696 = vmatprep.subr.bf16.mxu1 %v897_v0  ;;  %v72_v12 = vld [vmem:[#allocation3] sm:$0xf]  ;;  %v971_v13 = vld [vmem:[#allocation8 + $0x20] sm:$0xff]   ;;  %v980_v15 = vld [vmem:[#allocation8 + $0x10] sm:$0xff]   ;;  %v1000_v20 = vsub.s32 0, %v181_v19  ;;  %v1002_v21 = vsub.s32 1, %v181_v19  ;;  %p862_p6 = scmp.ne.s32.totalorder %s612_s3, %s861_s11  ;;  %p867_p8 = scmp.lt.s32.totalorder %s861_s11, %s861_s11 }
  0x39   :  { %v977_v14 = vld [vmem:[#allocation8 + $0x18] sm:$0xff]   ;;  %v986_v16 = vld [vmem:[#allocation8 + $0x8] sm:$0xff]   ;;  %v992_v17 = vld [vmem:[#allocation8] sm:$0xff]   ;;  %v1004_v22 = vsub.s32 3, %v181_v19  ;;  %v1006_v24 = vsub.s32 6, %v181_v19  ;;  %v1008_v25 = vsub.s32 2, %v181_v19 }
  0x3a   :  { %v178_v23 = vld [vmem:[#allocation9] sm:$0xff]  ;;  %v1010_v26 = vsub.s32 7, %v181_v19  ;;  %v1015_v30 = vsub.s32 5, %v181_v19  ;;  %v1022_v35 = vsub.s32 4, %v181_v19  ;;  %v237_v62 = vld [vmem:[#allocation9 + $0x8] sm:$0xff]  ;;  %p868_p9 = por %p867_p8, %p866_p7 }
  0x3b   :  { %677 = vmatpush3.bf16.msra.mxu0 %v766_v2  ;;  %697 = vmatpush3.bf16.msra.mxu1 %v949_v6  ;;  %v183_v27 = vrot.slane %v178_v23, %v1000_v20  ;;  %v189_v28 = vrot.slane %v178_v23, %v1002_v21  ;;  %v206_v29 = vrot.slane %v178_v23, %v1004_v22 }
  0x3c   :  { %678 = vmatprep.subr.bf16.mxu0 %v897_v0  ;;  %698 = vmatprep.subr.bf16.mxu1 %v897_v0  ;;  %v217_v32 = vrot.slane %v178_v23, %v1006_v24  ;;  %v194_v34 = vrot.slane %v178_v23, %v1008_v25  ;;  %v222_v37 = vrot.slane %v178_v23, %v1010_v26  ;;  %p869_p10 = pnand %p868_p9, %p862_p6 }
  0x3d   :  { %v212_v41 = vrot.slane %v178_v23, %v1015_v30  ;;  %v201_v45 = vrot.slane %v178_v23, %v1022_v35  ;;  %v349_v2 = vrot.slane %v237_v62, %v1000_v20 }
  0x3f   :  { %679 = vmatpush3.bf16.msra.mxu0 %v767_v3  ;;  %699 = vmatpush3.bf16.msra.mxu1 %v954_v8  ;;  %v355_v3 = vrot.slane %v237_v62, %v1002_v21 }
  0x40   :  { %680 = vmatprep.subr.bf16.mxu0 %v897_v0  ;;  %700 = vmatprep.subr.bf16.mxu1 %v897_v0 }
  0x43   :  { %681 = vmatpush3.bf16.msra.mxu0 %v768_v5  ;;  %701 = vmatpush3.bf16.msra.mxu1 %v971_v13  ;;  %v383_v5 = vrot.slane %v237_v62, %v1006_v24 }
  0x44   :  { %682 = vmatprep.subr.bf16.mxu0 %v897_v0  ;;  %702 = vmatprep.subr.bf16.mxu1 %v897_v0 }
  0x47   :  { %683 = vmatpush3.bf16.msra.mxu0 %v769_v7  ;;  %703 = vmatpush3.bf16.msra.mxu1 %v977_v14 }
  0x48   :  { %684 = vmatprep.subr.bf16.mxu0 %v897_v0  ;;  %704 = vmatprep.subr.bf16.mxu1 %v897_v0 }
  0x4b   :  { %685 = vmatpush3.bf16.msra.mxu0 %v770_v9  ;;  %705 = vmatpush3.bf16.msra.mxu1 %v980_v15 }
  0x4c   :  { %686 = vmatprep.subr.bf16.mxu0 %v897_v0  ;;  %706 = vmatprep.subr.bf16.mxu1 %v897_v0 }
  0x4f   :  { %687 = vmatpush3.bf16.msra.mxu0 %v771_v10  ;;  %707 = vmatpush3.bf16.msra.mxu1 %v986_v16 }
  0x50   :  { %688 = vmatprep.subr.bf16.mxu0 %v897_v0  ;;  %708 = vmatprep.subr.bf16.mxu1 %v897_v0 }
  0x53   :  { %689 = vmatpush3.bf16.msra.mxu0 %v772_v11  ;;  %709 = vmatpush3.bf16.msra.mxu1 %v992_v17 }
  0x54   :  { %714 = vmatprep.subr.bf16.mxu0 %v897_v0  ;;  %734 = vmatprep.subr.bf16.mxu1 %v897_v0 }
  0x56   :  { %691 = vmatmul.mubr.bf16.vlgmr.msra.gmra.mxu0 %v72_v12 }
  0x57   :  { %715 = vmatpush3.bf16.msra.mxu0 %v945_v4  ;;  %730 = vmatprep.mubr.msk.bf16.mxu0 %vm898_vm0, %v897_v0 }
  0x58   :  { %716 = vmatprep.subr.bf16.mxu0 %v897_v0 }
  0x5b   :  { %717 = vmatpush3.bf16.msra.mxu0 %v949_v6 }
  0x5c   :  { %718 = vmatprep.subr.bf16.mxu0 %v897_v0 }
  0x5f   :  { %719 = vmatpush3.bf16.msra.mxu0 %v954_v8 }
  0x60   :  { %720 = vmatprep.subr.bf16.mxu0 %v897_v0 }
  0x63   :  { %721 = vmatpush3.bf16.msra.mxu0 %v971_v13 }
  0x64   :  { %722 = vmatprep.subr.bf16.mxu0 %v897_v0 }
  0x67   :  { %723 = vmatpush3.bf16.msra.mxu0 %v977_v14 }
  0x68   :  { %724 = vmatprep.subr.bf16.mxu0 %v897_v0 }
  0x6b   :  { %725 = vmatpush3.bf16.msra.mxu0 %v980_v15 }
  0x6c   :  { %726 = vmatprep.subr.bf16.mxu0 %v897_v0 }
  0x6f   :  { %727 = vmatpush3.bf16.msra.mxu0 %v986_v16 }
  0x70   :  { %728 = vmatprep.subr.bf16.mxu0 %v897_v0 }
  0x73   :  { %729 = vmatpush3.bf16.msra.mxu0 %v992_v17 }
 0x116   :  { %v1017_v31 = vpop.f32.mrf.mxu0 }
 0x117   :  { %v179_v33 = vand.u32 2147483647, %v1017_v31  ;;  %v232_v59 = vand.u32 2147483648, %v1017_v31 }
 0x118   :  { %v692_v36 = vpop.f32.mrf.mxu0 }
 0x119   :  { %v184_v38 = vsub.f32 %v179_v33, %v183_v27  ;;  %v190_v39 = vsub.f32 %v179_v33, %v189_v28  ;;  %v207_v40 = vsub.f32 %v179_v33, %v206_v29  ;;  %v218_v43 = vmul.f32 %v217_v32, %v179_v33 }
 0x11a   :  { %v174_v42 = vpop.f32.mrf.mxu0  ;;  %vm213_vm1 = vcmp.le.f32.partialorder %v179_v33, %v212_v41  ;;  %vm202_vm2 = vcmp.le.f32.partialorder %v179_v33, %v201_v45 }
 0x11b   :  { %v195_v44 = vmul.f32 %v194_v34, %v190_v39  ;;  %v208_v47 = vmax.f32 %v207_v40, 0.0  ;;  %v223_v48 = vsub.f32 %v218_v43, %v222_v37  ;;  %v185_v49 = vmax.f32 %v184_v38, 0.0  ;;  %v403_v42 = vld [vmem:[#allocation9 + $0x10] sm:$0xff] }
 0x11c   :  { %v693_v46 = vpop.f32.mrf.mxu0  ;;  %v450_v45 = vrot.slane %v403_v42, %v1000_v20 }
 0x11d   :  { %v196_v50 = vmax.f32 %v195_v44, 0.0  ;;  %v224_v51 = vsel %vm213_vm1, %v223_v48, %v179_v33  ;;  %v226_v54 = vmul.f32 0.33333334, %v185_v49  ;;  %v456_v46 = vrot.slane %v403_v42, %v1002_v21 }
 0x11e   :  { %v225_v53 = vsel %vm202_vm2, %v208_v47, %v224_v51  ;;  %v473_v47 = vrot.slane %v403_v42, %v1004_v22  ;;  %v484_v48 = vrot.slane %v403_v42, %v1006_v24  ;;  %v461_v51 = vrot.slane %v403_v42, %v1008_v25 }
 0x11f   :  { %v197_v52 = vmin.f32 %v179_v33, %v196_v50  ;;  %v229_v57 = vmul.f32 0.33333334, %v225_v53 }
 0x121   :  { %v227_v55 = vmul.f32 0.33333334, %v197_v52  ;;  %v489_v52 = vrot.slane %v403_v42, %v1010_v26 }
 0x123   :  { %v228_v56 = vadd.f32 %v227_v55, %v226_v54 }
 0x125   :  { %v230_v58 = vadd.f32 %v229_v57, %v228_v56  ;;  %v479_v57 = vrot.slane %v403_v42, %v1015_v30 }
 0x127   :  { %v234_v60 = vor.u32 %v232_v59, %v230_v58 }
 0x129   :  { %v239_v61 = vpack.c.bf16 %v234_v60, %v234_v60 }
 0x12b   :  { %711 = vmatmul.mubr.bf16.vlgmr.msra.gmra.mxu1 %v239_v61  ;;  %v468_v61 = vrot.slane %v403_v42, %v1022_v35 }
 0x12c   :  { %735 = vmatpush3.bf16.msra.mxu1 %v945_v4  ;;  %750 = vmatprep.mubr.msk.bf16.mxu1 %vm898_vm0, %v897_v0  ;;  %v372_v4 = vrot.slane %v237_v62, %v1004_v22 }
 0x12d   :  { %736 = vmatprep.subr.bf16.mxu1 %v897_v0 }
 0x130   :  { %737 = vmatpush3.bf16.msra.mxu1 %v949_v6 }
 0x131   :  { %738 = vmatprep.subr.bf16.mxu1 %v897_v0 }
 0x134   :  { %739 = vmatpush3.bf16.msra.mxu1 %v954_v8  ;;  %v360_v8 = vrot.slane %v237_v62, %v1008_v25 }
 0x135   :  { %740 = vmatprep.subr.bf16.mxu1 %v897_v0 }
 0x138   :  { %741 = vmatpush3.bf16.msra.mxu1 %v971_v13  ;;  %v378_v13 = vrot.slane %v237_v62, %v1015_v30 }
 0x139   :  { %742 = vmatprep.subr.bf16.mxu1 %v897_v0 }
 0x13c   :  { %743 = vmatpush3.bf16.msra.mxu1 %v977_v14 }
 0x13d   :  { %744 = vmatprep.subr.bf16.mxu1 %v897_v0 }
 0x140   :  { %745 = vmatpush3.bf16.msra.mxu1 %v980_v15 }
 0x141   :  { %746 = vmatprep.subr.bf16.mxu1 %v897_v0 }
 0x144   :  { %747 = vmatpush3.bf16.msra.mxu1 %v986_v16 }
 0x145   :  { %748 = vmatprep.subr.bf16.mxu1 %v897_v0  ;;  %v388_v0 = vrot.slane %v237_v62, %v1010_v26 }
 0x148   :  { %749 = vmatpush3.bf16.msra.mxu1 %v992_v17  ;;  %v367_v17 = vrot.slane %v237_v62, %v1022_v35 }
 0x1eb   :  { %v338_v63 = vpop.f32.mrf.mxu1 }
 0x1ec   :  { %v344_v1 = vadd.f32 %v338_v63, %v1017_v31 }
 0x1ed   :  { %v712_v6 = vpop.f32.mrf.mxu1 }
 0x1ee   :  { %v345_v7 = vand.u32 2147483647, %v344_v1  ;;  %v398_v39 = vand.u32 2147483648, %v344_v1 }
 0x1ef   :  { %v341_v9 = vpop.f32.mrf.mxu1 }
 0x1f0   :  { %v350_v10 = vsub.f32 %v345_v7, %v349_v2  ;;  %v356_v11 = vsub.f32 %v345_v7, %v355_v3  ;;  %v373_v12 = vsub.f32 %v345_v7, %v372_v4  ;;  %v384_v14 = vmul.f32 %v383_v5, %v345_v7 }
 0x1f1   :  { %v713_v15 = vpop.f32.mrf.mxu1  ;;  %vm379_vm3 = vcmp.le.f32.partialorder %v345_v7, %v378_v13  ;;  %vm368_vm4 = vcmp.le.f32.partialorder %v345_v7, %v367_v17  ;;  %v504_v13 = vld [vmem:[#allocation9 + $0x18] sm:$0xff] }
 0x1f2   :  { %v361_v16 = vmul.f32 %v360_v8, %v356_v11  ;;  %v374_v18 = vmax.f32 %v373_v12, 0.0  ;;  %v389_v19 = vsub.f32 %v384_v14, %v388_v0  ;;  %v351_v23 = vmax.f32 %v350_v10, 0.0 }
 0x1f3   :  { %v557_v17 = vrot.slane %v504_v13, %v1002_v21  ;;  %v569_v21 = vrot.slane %v504_v13, %v1022_v35 }
 0x1f4   :  { %v362_v27 = vmax.f32 %v361_v16, 0.0  ;;  %v390_v28 = vsel %vm379_vm3, %v389_v19, %v345_v7  ;;  %v392_v33 = vmul.f32 0.33333334, %v351_v23  ;;  %v551_v16 = vrot.slane %v504_v13, %v1000_v20 }
 0x1f5   :  { %v391_v32 = vsel %vm368_vm4, %v374_v18, %v390_v28  ;;  %v574_v18 = vrot.slane %v504_v13, %v1004_v22  ;;  %v585_v23 = vrot.slane %v504_v13, %v1006_v24  ;;  %v562_v28 = vrot.slane %v504_v13, %v1008_v25 }
 0x1f6   :  { %v363_v29 = vmin.f32 %v345_v7, %v362_v27  ;;  %v395_v37 = vmul.f32 0.33333334, %v391_v32  ;;  %v590_v32 = vrot.slane %v504_v13, %v1010_v26 }
 0x1f8   :  { %v393_v34 = vmul.f32 0.33333334, %v363_v29 }
 0x1fa   :  { %v394_v36 = vadd.f32 %v393_v34, %v392_v33 }
 0x1fc   :  { %v396_v38 = vadd.f32 %v395_v37, %v394_v36 }
 0x1fe   :  { %v400_v40 = vor.u32 %v398_v39, %v396_v38 }
 0x200   :  { %v404_v41 = vpack.c.bf16 %v400_v40, %v400_v40 }
 0x202   :  { %731 = vmatmul.mubr.bf16.vlgmr.msra.gmra.mxu0 %v404_v41 }
 0x2c2   :  { %v439_v43 = vpop.f32.mrf.mxu0 }
 0x2c3   :  { %v445_v44 = vadd.f32 %v439_v43, %v1017_v31 }
 0x2c4   :  { %v732_v49 = vpop.f32.mrf.mxu0 }
 0x2c5   :  { %v446_v50 = vand.u32 2147483647, %v445_v44  ;;  %v499_v10 = vand.u32 2147483648, %v445_v44 }
 0x2c6   :  { %v442_v53 = vpop.f32.mrf.mxu0 }
 0x2c7   :  { %v451_v54 = vsub.f32 %v446_v50, %v450_v45  ;;  %v457_v55 = vsub.f32 %v446_v50, %v456_v46  ;;  %v474_v56 = vsub.f32 %v446_v50, %v473_v47  ;;  %v485_v58 = vmul.f32 %v484_v48, %v446_v50 }
 0x2c8   :  { %v733_v59 = vpop.f32.mrf.mxu0  ;;  %vm480_vm5 = vcmp.le.f32.partialorder %v446_v50, %v479_v57  ;;  %vm469_vm6 = vcmp.le.f32.partialorder %v446_v50, %v468_v61 }
 0x2c9   :  { %v462_v60 = vmul.f32 %v461_v51, %v457_v55  ;;  %v475_v62 = vmax.f32 %v474_v56, 0.0  ;;  %v490_v63 = vsub.f32 %v485_v58, %v489_v52  ;;  %v452_v1 = vmax.f32 %v451_v54, 0.0 }
 0x2cb   :  { %v463_v2 = vmax.f32 %v462_v60, 0.0  ;;  %v491_v3 = vsel %vm480_vm5, %v490_v63, %v446_v50  ;;  %v493_v6 = vmul.f32 0.33333334, %v452_v1 }
 0x2cc   :  { %v492_v5 = vsel %vm469_vm6, %v475_v62, %v491_v3 }
 0x2cd   :  { %v464_v4 = vmin.f32 %v446_v50, %v463_v2  ;;  %v496_v0 = vmul.f32 0.33333334, %v492_v5 }
 0x2cf   :  { %v494_v7 = vmul.f32 0.33333334, %v464_v4 }
 0x2d1   :  { %v495_v8 = vadd.f32 %v494_v7, %v493_v6 }
 0x2d3   :  { %v497_v9 = vadd.f32 %v496_v0, %v495_v8 }
 0x2d5   :  { %v501_v11 = vor.u32 %v499_v10, %v497_v9 }
 0x2d7   :  { %v505_v12 = vpack.c.bf16 %v501_v11, %v501_v11 }
 0x2d9   :  { %751 = vmatmul.mubr.bf16.vlgmr.msra.gmra.mxu1 %v505_v12 }
 0x399   :  { %v540_v14 = vpop.f32.mrf.mxu1 }
 0x39a   :  { %v546_v15 = vadd.f32 %v540_v14, %v1017_v31  ;;  %v580_v31 = vrot.slane %v504_v13, %v1015_v30 }
 0x39b   :  { %v752_v19 = vpop.f32.mrf.mxu1 }
 0x39c   :  { %v547_v27 = vand.u32 2147483647, %v546_v15  ;;  %v600_v30 = vand.u32 2147483648, %v546_v15 }
 0x39d   :  { %v543_v29 = vpop.f32.mrf.mxu1 }
 0x39e   :  { %v552_v33 = vsub.f32 %v547_v27, %v551_v16  ;;  %v558_v34 = vsub.f32 %v547_v27, %v557_v17  ;;  %v575_v36 = vsub.f32 %v547_v27, %v574_v18  ;;  %v586_v20 = vmul.f32 %v585_v23, %v547_v27 }
 0x39f   :  { %v753_v37 = vpop.f32.mrf.mxu1  ;;  %vm581_vm7 = vcmp.le.f32.partialorder %v547_v27, %v580_v31  ;;  %vm570_vm8 = vcmp.le.f32.partialorder %v547_v27, %v569_v21 }
 0x3a0   :  { %v563_v38 = vmul.f32 %v562_v28, %v558_v34  ;;  %v576_v22 = vmax.f32 %v575_v36, 0.0  ;;  %v591_v39 = vsub.f32 %v586_v20, %v590_v32  ;;  %v553_v40 = vmax.f32 %v552_v33, 0.0 }
 0x3a2   :  { %v564_v24 = vmax.f32 %v563_v38, 0.0  ;;  %v592_v41 = vsel %vm581_vm7, %v591_v39, %v547_v27  ;;  %v594_v26 = vmul.f32 0.33333334, %v553_v40 }
 0x3a3   :  { %v593_v42 = vsel %vm570_vm8, %v576_v22, %v592_v41 }
 0x3a4   :  { %v565_v25 = vmin.f32 %v547_v27, %v564_v24  ;;  %v597_v45 = vmul.f32 0.33333334, %v593_v42 }
 0x3a6   :  { %v595_v43 = vmul.f32 0.33333334, %v565_v25 }
 0x3a8   :  { %v596_v44 = vadd.f32 %v595_v43, %v594_v26 }
 0x3aa   :  { %v598_v46 = vadd.f32 %v597_v45, %v596_v44 }
 0x3ac   :  { %v602_v47 = vor.u32 %v600_v30, %v598_v46 }
 0x3ae   :  { %604 = vst [vmem:[#allocation11] sm:$0xff] %v602_v47 }
 0x3af   :  { %872 = shalt.err (!%p869_p10)
}
 0x3b0   :  { %614 = dma.vmem_to_hbm [thread:$0]  %s612_s3, 128, %s1079_s4, [#allocation5]  }
 0x3b1   :  { %887 = dma.done.wait [#allocation5], 128  }
 0x3b2   :  { %888 = vsyncadd [#allocation5], 4294967168 }
 0x3b3   :  { %618 = vsyncpa [#allocation4], 1 }
 0x3b4   :  { %619 = vsyncpa [#allocation7], 1 }
 0x3b5   :  { %620 = vsyncpa [#allocation10], 1 }
 0x3b6   :  { %621 = vsyncpa [#allocation5], 1 }

// kernel: tpu_custom_call.1
= control target key start
LH: loop header
LB: loop body
LE: loop exit
PB: predicated region body
PF: predicated region fallthrough
CT: control target
= control target key end

     0   :  { %9 = vsyncpa [#allocation4], 0  ;;  %s1075_s0 = inlined_call_operand.hbm [shape: bf16[8,128], index: 0, kind: input, shape index: {}]   ;;  %s1076_s1 = inlined_call_operand.hbm [shape: bf16[128,128], index: 1, kind: input, shape index: {}]   ;;  %s1077_s2 = inlined_call_operand.hbm [shape: bf16[128,128], index: 2, kind: input, shape index: {}]   ;;  %s1078_s3 = inlined_call_operand.hbm [shape: f32[4,8,128], index: 3, kind: input, shape index: {}]   ;;  %s1079_s4 = inlined_call_operand.hbm [shape: f32[8,128], index: 4, kind: output, shape index: {}]  }
   0x1   :  { %10 = vsyncpa [#allocation7], 0 }
   0x2   :  { %11 = vsyncpa [#allocation10], 0 }
   0x3   :  { %12 = vsyncpa [#allocation5], 0  ;;  %s889_s15 = smov [#allocation6]  }
   0x4   :  { %s28_s16 = sshll.u32 %s889_s15, 4  ;;  %s29_s16 = int_to_ptr.vmem [resolvable:$true] %s28_s16 }
   0x5   :  { %s789_s17 = scalar_lea.vmem %s29_s16, 1024  ;;  %p794_p1 = scmp.lt.s32.totalorder %s29_s16, %s29_s16 }
   0x6   :  { %p790_p0 = scmp.ne.s32.totalorder %s29_s16, %s789_s17  ;;  %p795_p2 = scmp.lt.s32.totalorder %s789_s17, %s789_s17 }
   0x8   :  { %p796_p3 = por %p795_p2, %p794_p1 }
   0xa   :  { %p797_p4 = pnand %p796_p3, %p790_p0 }
   0xc   :  { %800 = shalt.err (!%p797_p4)
}
   0xd   :  { %s890_s18 = smov 64   ;;  %s891_s19 = smov 4  }
   0xe   :  { %34 = dma.hbm_to_vmem [thread:$0]  %s1076_s1, 1024, %s29_s16, [#allocation7], %s890_s18, %s890_s18, %s891_s19  }
   0xf   :  { %s892_s22 = smov [#allocation3]   ;;  %s893_s24 = smov [#allocation8]  }
  0x10   :  { %s19_s23 = sshll.u32 %s892_s22, 4  ;;  %s40_s25 = sshll.u32 %s893_s24, 4  ;;  %s20_s23 = int_to_ptr.vmem [resolvable:$true] %s19_s23  ;;  %s41_s25 = int_to_ptr.vmem [resolvable:$true] %s40_s25 }
  0x11   :  { %s809_s26 = scalar_lea.vmem %s20_s23, 64  ;;  %p814_p6 = scmp.lt.s32.totalorder %s20_s23, %s20_s23 }
  0x12   :  { %p810_p5 = scmp.ne.s32.totalorder %s20_s23, %s809_s26  ;;  %p815_p7 = scmp.lt.s32.totalorder %s809_s26, %s809_s26 }
  0x14   :  { %p816_p8 = por %p815_p7, %p814_p6 }
  0x16   :  { %p817_p9 = pnand %p816_p8, %p810_p5 }
  0x18   :  { %820 = shalt.err (!%p817_p9)
}
  0x19   :  { %22 = dma.hbm_to_vmem [thread:$0]  %s1075_s0, 64, %s20_s23, [#allocation4]  }
  0x1a   :  { %s829_s29 = scalar_lea.vmem %s41_s25, 1024  ;;  %p834_p11 = scmp.lt.s32.totalorder %s41_s25, %s41_s25 }
  0x1b   :  { %p830_p10 = scmp.ne.s32.totalorder %s41_s25, %s829_s29  ;;  %p835_p12 = scmp.lt.s32.totalorder %s829_s29, %s829_s29 }
  0x1d   :  { %p836_p13 = por %p835_p12, %p834_p11 }
  0x1f   :  { %p837_p0 = pnand %p836_p13, %p830_p10 }
  0x21   :  { %840 = shalt.err (!%p837_p0)
}
  0x22   :  { %46 = dma.hbm_to_vmem [thread:$0]  %s1077_s2, 1024, %s41_s25, [#allocation7], %s890_s18, %s890_s18, %s891_s19  }
  0x23   :  { %s894_s5 = smov [#allocation9]  }
  0x24   :  { %s52_s6 = sshll.u32 %s894_s5, 4  ;;  %s53_s6 = int_to_ptr.vmem [resolvable:$true] %s52_s6 }
  0x25   :  { %s849_s7 = scalar_lea.vmem %s53_s6, 512  ;;  %p854_p2 = scmp.lt.s32.totalorder %s53_s6, %s53_s6 }
  0x26   :  { %p850_p1 = scmp.ne.s32.totalorder %s53_s6, %s849_s7  ;;  %p855_p3 = scmp.lt.s32.totalorder %s849_s7, %s849_s7 }
  0x28   :  { %p856_p4 = por %p855_p3, %p854_p2 }
  0x2a   :  { %p857_p5 = pnand %p856_p4, %p850_p1 }
  0x2c   :  { %860 = shalt.err (!%p857_p5)
}
  0x2d   :  { %s895_s0 = smov 128   ;;  %s896_s8 = smov 8  }
  0x2e   :  { %58 = dma.hbm_to_vmem [thread:$0]  %s1078_s3, 512, %s53_s6, [#allocation10], %s895_s0, %s895_s0, %s896_s8  }
  0x2f   :  { %881 = dma.done.wait [#allocation4], 64  }
  0x30   :  { %882 = vsyncadd [#allocation4], 4294967232 }
  0x31   :  { %883 = dma.done.wait [#allocation7], 2048  }
  0x32   :  { %884 = vsyncadd [#allocation7], 4294965248 }
  0x33   :  { %885 = dma.done.wait [#allocation10], 512  }
  0x34   :  { %886 = vsyncadd [#allocation10], 4294966784  ;;  %v897_v0 = vmov 0.0   ;;  %vm898_vm0 = vmmov 0   ;;  %v765_v1 = vld [vmem:[#allocation6 + $0x38] sm:$0xff]   ;;  %v766_v2 = vld [vmem:[#allocation6 + $0x30] sm:$0xff]   ;;  %v180_v18 = vlaneseq }
  0x35   :  { %674 = vmatprep.subr.bf16.mxu0 %v897_v0  ;;  %690 = vmatprep.mubr.msk.bf16.mxu0 %vm898_vm0, %v897_v0  ;;  %v767_v3 = vld [vmem:[#allocation6 + $0x28] sm:$0xff]   ;;  %v945_v4 = vld [vmem:[#allocation8 + $0x38] sm:$0xff]   ;;  %v768_v5 = vld [vmem:[#allocation6 + $0x20] sm:$0xff]   ;;  %s899_s2 = smov [#allocation11]  }
  0x36   :  { %694 = vmatprep.subr.bf16.mxu1 %v897_v0  ;;  %710 = vmatprep.mubr.msk.bf16.mxu1 %vm898_vm0, %v897_v0  ;;  %v949_v6 = vld [vmem:[#allocation8 + $0x30] sm:$0xff]   ;;  %v769_v7 = vld [vmem:[#allocation6 + $0x18] sm:$0xff]   ;;  %v954_v8 = vld [vmem:[#allocation8 + $0x28] sm:$0xff]   ;;  %v181_v19 = vshrl.u32 %v180_v18, 7  ;;  %s611_s3 = sshll.u32 %s899_s2, 4  ;;  %s612_s3 = int_to_ptr.vmem [resolvable:$true] %s611_s3 }
  0x37   :  { %675 = vmatpush3.bf16.msra.mxu0 %v765_v1  ;;  %695 = vmatpush3.bf16.msra.mxu1 %v945_v4  ;;  %v770_v9 = vld [vmem:[#allocation6 + $0x10] sm:$0xff]   ;;  %v771_v10 = vld [vmem:[#allocation6 + $0x8] sm:$0xff]   ;;  %v772_v11 = vld [vmem:[#allocation6] sm:$0xff]   ;;  %s861_s11 = scalar_lea.vmem %s612_s3, 128  ;;  %p866_p7 = scmp.lt.s32.totalorder %s612_s3, %s612_s3 }
  0x38   :  { %676 = vmatprep.subr.bf16.mxu0 %v897_v0  ;;  %696 = vmatprep.subr.bf16.mxu1 %v897_v0  ;;  %v72_v12 = vld [vmem:[#allocation3] sm:$0xf]  ;;  %v971_v13 = vld [vmem:[#allocation8 + $0x20] sm:$0xff]   ;;  %v980_v15 = vld [vmem:[#allocation8 + $0x10] sm:$0xff]   ;;  %v1000_v20 = vsub.s32 0, %v181_v19  ;;  %v1002_v21 = vsub.s32 1, %v181_v19  ;;  %p862_p6 = scmp.ne.s32.totalorder %s612_s3, %s861_s11  ;;  %p867_p8 = scmp.lt.s32.totalorder %s861_s11, %s861_s11 }
  0x39   :  { %v977_v14 = vld [vmem:[#allocation8 + $0x18] sm:$0xff]   ;;  %v986_v16 = vld [vmem:[#allocation8 + $0x8] sm:$0xff]   ;;  %v992_v17 = vld [vmem:[#allocation8] sm:$0xff]   ;;  %v1004_v22 = vsub.s32 3, %v181_v19  ;;  %v1006_v24 = vsub.s32 6, %v181_v19  ;;  %v1008_v25 = vsub.s32 2, %v181_v19 }
  0x3a   :  { %v178_v23 = vld [vmem:[#allocation9] sm:$0xff]  ;;  %v1010_v26 = vsub.s32 7, %v181_v19  ;;  %v1015_v30 = vsub.s32 5, %v181_v19  ;;  %v1022_v35 = vsub.s32 4, %v181_v19  ;;  %v237_v62 = vld [vmem:[#allocation9 + $0x8] sm:$0xff]  ;;  %p868_p9 = por %p867_p8, %p866_p7 }
  0x3b   :  { %677 = vmatpush3.bf16.msra.mxu0 %v766_v2  ;;  %697 = vmatpush3.bf16.msra.mxu1 %v949_v6  ;;  %v183_v27 = vrot.slane %v178_v23, %v1000_v20  ;;  %v189_v28 = vrot.slane %v178_v23, %v1002_v21  ;;  %v206_v29 = vrot.slane %v178_v23, %v1004_v22 }
  0x3c   :  { %678 = vmatprep.subr.bf16.mxu0 %v897_v0  ;;  %698 = vmatprep.subr.bf16.mxu1 %v897_v0  ;;  %v217_v32 = vrot.slane %v178_v23, %v1006_v24  ;;  %v194_v34 = vrot.slane %v178_v23, %v1008_v25  ;;  %v222_v37 = vrot.slane %v178_v23, %v1010_v26  ;;  %p869_p10 = pnand %p868_p9, %p862_p6 }
  0x3d   :  { %v212_v41 = vrot.slane %v178_v23, %v1015_v30  ;;  %v201_v45 = vrot.slane %v178_v23, %v1022_v35  ;;  %v349_v2 = vrot.slane %v237_v62, %v1000_v20 }
  0x3f   :  { %679 = vmatpush3.bf16.msra.mxu0 %v767_v3  ;;  %699 = vmatpush3.bf16.msra.mxu1 %v954_v8  ;;  %v355_v3 = vrot.slane %v237_v62, %v1002_v21 }
  0x40   :  { %680 = vmatprep.subr.bf16.mxu0 %v897_v0  ;;  %700 = vmatprep.subr.bf16.mxu1 %v897_v0 }
  0x43   :  { %681 = vmatpush3.bf16.msra.mxu0 %v768_v5  ;;  %701 = vmatpush3.bf16.msra.mxu1 %v971_v13  ;;  %v383_v5 = vrot.slane %v237_v62, %v1006_v24 }
  0x44   :  { %682 = vmatprep.subr.bf16.mxu0 %v897_v0  ;;  %702 = vmatprep.subr.bf16.mxu1 %v897_v0 }
  0x47   :  { %683 = vmatpush3.bf16.msra.mxu0 %v769_v7  ;;  %703 = vmatpush3.bf16.msra.mxu1 %v977_v14 }
  0x48   :  { %684 = vmatprep.subr.bf16.mxu0 %v897_v0  ;;  %704 = vmatprep.subr.bf16.mxu1 %v897_v0 }
  0x4b   :  { %685 = vmatpush3.bf16.msra.mxu0 %v770_v9  ;;  %705 = vmatpush3.bf16.msra.mxu1 %v980_v15 }
  0x4c   :  { %686 = vmatprep.subr.bf16.mxu0 %v897_v0  ;;  %706 = vmatprep.subr.bf16.mxu1 %v897_v0 }
  0x4f   :  { %687 = vmatpush3.bf16.msra.mxu0 %v771_v10  ;;  %707 = vmatpush3.bf16.msra.mxu1 %v986_v16 }
  0x50   :  { %688 = vmatprep.subr.bf16.mxu0 %v897_v0  ;;  %708 = vmatprep.subr.bf16.mxu1 %v897_v0 }
  0x53   :  { %689 = vmatpush3.bf16.msra.mxu0 %v772_v11  ;;  %709 = vmatpush3.bf16.msra.mxu1 %v992_v17 }
  0x54   :  { %714 = vmatprep.subr.bf16.mxu0 %v897_v0  ;;  %734 = vmatprep.subr.bf16.mxu1 %v897_v0 }
  0x56   :  { %691 = vmatmul.mubr.bf16.vlgmr.msra.gmra.mxu0 %v72_v12 }
  0x57   :  { %715 = vmatpush3.bf16.msra.mxu0 %v945_v4  ;;  %730 = vmatprep.mubr.msk.bf16.mxu0 %vm898_vm0, %v897_v0 }
  0x58   :  { %716 = vmatprep.subr.bf16.mxu0 %v897_v0 }
  0x5b   :  { %717 = vmatpush3.bf16.msra.mxu0 %v949_v6 }
  0x5c   :  { %718 = vmatprep.subr.bf16.mxu0 %v897_v0 }
  0x5f   :  { %719 = vmatpush3.bf16.msra.mxu0 %v954_v8 }
  0x60   :  { %720 = vmatprep.subr.bf16.mxu0 %v897_v0 }
  0x63   :  { %721 = vmatpush3.bf16.msra.mxu0 %v971_v13 }
  0x64   :  { %722 = vmatprep.subr.bf16.mxu0 %v897_v0 }
  0x67   :  { %723 = vmatpush3.bf16.msra.mxu0 %v977_v14 }
  0x68   :  { %724 = vmatprep.subr.bf16.mxu0 %v897_v0 }
  0x6b   :  { %725 = vmatpush3.bf16.msra.mxu0 %v980_v15 }
  0x6c   :  { %726 = vmatprep.subr.bf16.mxu0 %v897_v0 }
  0x6f   :  { %727 = vmatpush3.bf16.msra.mxu0 %v986_v16 }
  0x70   :  { %728 = vmatprep.subr.bf16.mxu0 %v897_v0 }
  0x73   :  { %729 = vmatpush3.bf16.msra.mxu0 %v992_v17 }
 0x116   :  { %v1017_v31 = vpop.f32.mrf.mxu0 }
 0x117   :  { %v179_v33 = vand.u32 2147483647, %v1017_v31  ;;  %v232_v59 = vand.u32 2147483648, %v1017_v31 }
 0x118   :  { %v692_v36 = vpop.f32.mrf.mxu0 }
 0x119   :  { %v184_v38 = vsub.f32 %v179_v33, %v183_v27  ;;  %v190_v39 = vsub.f32 %v179_v33, %v189_v28  ;;  %v207_v40 = vsub.f32 %v179_v33, %v206_v29  ;;  %v218_v43 = vmul.f32 %v217_v32, %v179_v33 }
 0x11a   :  { %v174_v42 = vpop.f32.mrf.mxu0  ;;  %vm213_vm1 = vcmp.le.f32.partialorder %v179_v33, %v212_v41  ;;  %vm202_vm2 = vcmp.le.f32.partialorder %v179_v33, %v201_v45 }
 0x11b   :  { %v195_v44 = vmul.f32 %v194_v34, %v190_v39  ;;  %v208_v47 = vmax.f32 %v207_v40, 0.0  ;;  %v223_v48 = vsub.f32 %v218_v43, %v222_v37  ;;  %v185_v49 = vmax.f32 %v184_v38, 0.0  ;;  %v403_v42 = vld [vmem:[#allocation9 + $0x10] sm:$0xff] }
 0x11c   :  { %v693_v46 = vpop.f32.mrf.mxu0  ;;  %v450_v45 = vrot.slane %v403_v42, %v1000_v20 }
 0x11d   :  { %v196_v50 = vmax.f32 %v195_v44, 0.0  ;;  %v224_v51 = vsel %vm213_vm1, %v223_v48, %v179_v33  ;;  %v226_v54 = vmul.f32 0.33333334, %v185_v49  ;;  %v456_v46 = vrot.slane %v403_v42, %v1002_v21 }
 0x11e   :  { %v225_v53 = vsel %vm202_vm2, %v208_v47, %v224_v51  ;;  %v473_v47 = vrot.slane %v403_v42, %v1004_v22  ;;  %v484_v48 = vrot.slane %v403_v42, %v1006_v24  ;;  %v461_v51 = vrot.slane %v403_v42, %v1008_v25 }
 0x11f   :  { %v197_v52 = vmin.f32 %v179_v33, %v196_v50  ;;  %v229_v57 = vmul.f32 0.33333334, %v225_v53 }
 0x121   :  { %v227_v55 = vmul.f32 0.33333334, %v197_v52  ;;  %v489_v52 = vrot.slane %v403_v42, %v1010_v26 }
 0x123   :  { %v228_v56 = vadd.f32 %v227_v55, %v226_v54 }
 0x125   :  { %v230_v58 = vadd.f32 %v229_v57, %v228_v56  ;;  %v479_v57 = vrot.slane %v403_v42, %v1015_v30 }
 0x127   :  { %v234_v60 = vor.u32 %v232_v59, %v230_v58 }
 0x129   :  { %v239_v61 = vpack.c.bf16 %v234_v60, %v234_v60 }
 0x12b   :  { %711 = vmatmul.mubr.bf16.vlgmr.msra.gmra.mxu1 %v239_v61  ;;  %v468_v61 = vrot.slane %v403_v42, %v1022_v35 }
 0x12c   :  { %735 = vmatpush3.bf16.msra.mxu1 %v945_v4  ;;  %750 = vmatprep.mubr.msk.bf16.mxu1 %vm898_vm0, %v897_v0  ;;  %v372_v4 = vrot.slane %v237_v62, %v1004_v22 }
 0x12d   :  { %736 = vmatprep.subr.bf16.mxu1 %v897_v0 }
 0x130   :  { %737 = vmatpush3.bf16.msra.mxu1 %v949_v6 }
 0x131   :  { %738 = vmatprep.subr.bf16.mxu1 %v897_v0 }
 0x134   :  { %739 = vmatpush3.bf16.msra.mxu1 %v954_v8  ;;  %v360_v8 = vrot.slane %v237_v62, %v1008_v25 }
 0x135   :  { %740 = vmatprep.subr.bf16.mxu1 %v897_v0 }
 0x138   :  { %741 = vmatpush3.bf16.msra.mxu1 %v971_v13  ;;  %v378_v13 = vrot.slane %v237_v62, %v1015_v30 }
 0x139   :  { %742 = vmatprep.subr.bf16.mxu1 %v897_v0 }
 0x13c   :  { %743 = vmatpush3.bf16.msra.mxu1 %v977_v14 }
 0x13d   :  { %744 = vmatprep.subr.bf16.mxu1 %v897_v0 }
 0x140   :  { %745 = vmatpush3.bf16.msra.mxu1 %v980_v15 }
 0x141   :  { %746 = vmatprep.subr.bf16.mxu1 %v897_v0 }
 0x144   :  { %747 = vmatpush3.bf16.msra.mxu1 %v986_v16 }
 0x145   :  { %748 = vmatprep.subr.bf16.mxu1 %v897_v0  ;;  %v388_v0 = vrot.slane %v237_v62, %v1010_v26 }
 0x148   :  { %749 = vmatpush3.bf16.msra.mxu1 %v992_v17  ;;  %v367_v17 = vrot.slane %v237_v62, %v1022_v35 }
 0x1eb   :  { %v338_v63 = vpop.f32.mrf.mxu1 }
 0x1ec   :  { %v344_v1 = vadd.f32 %v338_v63, %v1017_v31 }
 0x1ed   :  { %v712_v6 = vpop.f32.mrf.mxu1 }
 0x1ee   :  { %v345_v7 = vand.u32 2147483647, %v344_v1  ;;  %v398_v39 = vand.u32 2147483648, %v344_v1 }
 0x1ef   :  { %v341_v9 = vpop.f32.mrf.mxu1 }
 0x1f0   :  { %v350_v10 = vsub.f32 %v345_v7, %v349_v2  ;;  %v356_v11 = vsub.f32 %v345_v7, %v355_v3  ;;  %v373_v12 = vsub.f32 %v345_v7, %v372_v4  ;;  %v384_v14 = vmul.f32 %v383_v5, %v345_v7 }
 0x1f1   :  { %v713_v15 = vpop.f32.mrf.mxu1  ;;  %vm379_vm3 = vcmp.le.f32.partialorder %v345_v7, %v378_v13  ;;  %vm368_vm4 = vcmp.le.f32.partialorder %v345_v7, %v367_v17  ;;  %v504_v13 = vld [vmem:[#allocation9 + $0x18] sm:$0xff] }
 0x1f2   :  { %v361_v16 = vmul.f32 %v360_v8, %v356_v11  ;;  %v374_v18 = vmax.f32 %v373_v12, 0.0  ;;  %v389_v19 = vsub.f32 %v384_v14, %v388_v0  ;;  %v351_v23 = vmax.f32 %v350_v10, 0.0 }
 0x1f3   :  { %v557_v17 = vrot.slane %v504_v13, %v1002_v21  ;;  %v569_v21 = vrot.slane %v504_v13, %v1022_v35 }
 0x1f4   :  { %v362_v27 = vmax.f32 %v361_v16, 0.0  ;;  %v390_v28 = vsel %vm379_vm3, %v389_v19, %v345_v7  ;;  %v392_v33 = vmul.f32 0.33333334, %v351_v23  ;;  %v551_v16 = vrot.slane %v504_v13, %v1000_v20 }
 0x1f5   :  { %v391_v32 = vsel %vm368_vm4, %v374_v18, %v390_v28  ;;  %v574_v18 = vrot.slane %v504_v13, %v1004_v22  ;;  %v585_v23 = vrot.slane %v504_v13, %v1006_v24  ;;  %v562_v28 = vrot.slane %v504_v13, %v1008_v25 }
 0x1f6   :  { %v363_v29 = vmin.f32 %v345_v7, %v362_v27  ;;  %v395_v37 = vmul.f32 0.33333334, %v391_v32  ;;  %v590_v32 = vrot.slane %v504_v13, %v1010_v26 }
 0x1f8   :  { %v393_v34 = vmul.f32 0.33333334, %v363_v29 }
 0x1fa   :  { %v394_v36 = vadd.f32 %v393_v34, %v392_v33 }
 0x1fc   :  { %v396_v38 = vadd.f32 %v395_v37, %v394_v36 }
 0x1fe   :  { %v400_v40 = vor.u32 %v398_v39, %v396_v38 }
 0x200   :  { %v404_v41 = vpack.c.bf16 %v400_v40, %v400_v40 }
 0x202   :  { %731 = vmatmul.mubr.bf16.vlgmr.msra.gmra.mxu0 %v404_v41 }
 0x2c2   :  { %v439_v43 = vpop.f32.mrf.mxu0 }
 0x2c3   :  { %v445_v44 = vadd.f32 %v439_v43, %v1017_v31 }
 0x2c4   :  { %v732_v49 = vpop.f32.mrf.mxu0 }
 0x2c5   :  { %v446_v50 = vand.u32 2147483647, %v445_v44  ;;  %v499_v10 = vand.u32 2147483648, %v445_v44 }
 0x2c6   :  { %v442_v53 = vpop.f32.mrf.mxu0 }
 0x2c7   :  { %v451_v54 = vsub.f32 %v446_v50, %v450_v45  ;;  %v457_v55 = vsub.f32 %v446_v50, %v456_v46  ;;  %v474_v56 = vsub.f32 %v446_v50, %v473_v47  ;;  %v485_v58 = vmul.f32 %v484_v48, %v446_v50 }
 0x2c8   :  { %v733_v59 = vpop.f32.mrf.mxu0  ;;  %vm480_vm5 = vcmp.le.f32.partialorder %v446_v50, %v479_v57  ;;  %vm469_vm6 = vcmp.le.f32.partialorder %v446_v50, %v468_v61 }
 0x2c9   :  { %v462_v60 = vmul.f32 %v461_v51, %v457_v55  ;;  %v475_v62 = vmax.f32 %v474_v56, 0.0  ;;  %v490_v63 = vsub.f32 %v485_v58, %v489_v52  ;;  %v452_v1 = vmax.f32 %v451_v54, 0.0 }
 0x2cb   :  { %v463_v2 = vmax.f32 %v462_v60, 0.0  ;;  %v491_v3 = vsel %vm480_vm5, %v490_v63, %v446_v50  ;;  %v493_v6 = vmul.f32 0.33333334, %v452_v1 }
 0x2cc   :  { %v492_v5 = vsel %vm469_vm6, %v475_v62, %v491_v3 }
 0x2cd   :  { %v464_v4 = vmin.f32 %v446_v50, %v463_v2  ;;  %v496_v0 = vmul.f32 0.33333334, %v492_v5 }
 0x2cf   :  { %v494_v7 = vmul.f32 0.33333334, %v464_v4 }
 0x2d1   :  { %v495_v8 = vadd.f32 %v494_v7, %v493_v6 }
 0x2d3   :  { %v497_v9 = vadd.f32 %v496_v0, %v495_v8 }
 0x2d5   :  { %v501_v11 = vor.u32 %v499_v10, %v497_v9 }
 0x2d7   :  { %v505_v12 = vpack.c.bf16 %v501_v11, %v501_v11 }
 0x2d9   :  { %751 = vmatmul.mubr.bf16.vlgmr.msra.gmra.mxu1 %v505_v12 }
 0x399   :  { %v540_v14 = vpop.f32.mrf.mxu1 }
 0x39a   :  { %v546_v15 = vadd.f32 %v540_v14, %v1017_v31  ;;  %v580_v31 = vrot.slane %v504_v13, %v1015_v30 }
 0x39b   :  { %v752_v19 = vpop.f32.mrf.mxu1 }
 0x39c   :  { %v547_v27 = vand.u32 2147483647, %v546_v15  ;;  %v600_v30 = vand.u32 2147483648, %v546_v15 }
 0x39d   :  { %v543_v29 = vpop.f32.mrf.mxu1 }
 0x39e   :  { %v552_v33 = vsub.f32 %v547_v27, %v551_v16  ;;  %v558_v34 = vsub.f32 %v547_v27, %v557_v17  ;;  %v575_v36 = vsub.f32 %v547_v27, %v574_v18  ;;  %v586_v20 = vmul.f32 %v585_v23, %v547_v27 }
 0x39f   :  { %v753_v37 = vpop.f32.mrf.mxu1  ;;  %vm581_vm7 = vcmp.le.f32.partialorder %v547_v27, %v580_v31  ;;  %vm570_vm8 = vcmp.le.f32.partialorder %v547_v27, %v569_v21 }
 0x3a0   :  { %v563_v38 = vmul.f32 %v562_v28, %v558_v34  ;;  %v576_v22 = vmax.f32 %v575_v36, 0.0  ;;  %v591_v39 = vsub.f32 %v586_v20, %v590_v32  ;;  %v553_v40 = vmax.f32 %v552_v33, 0.0 }
 0x3a2   :  { %v564_v24 = vmax.f32 %v563_v38, 0.0  ;;  %v592_v41 = vsel %vm581_vm7, %v591_v39, %v547_v27  ;;  %v594_v26 = vmul.f32 0.33333334, %v553_v40 }
 0x3a3   :  { %v593_v42 = vsel %vm570_vm8, %v576_v22, %v592_v41 }
 0x3a4   :  { %v565_v25 = vmin.f32 %v547_v27, %v564_v24  ;;  %v597_v45 = vmul.f32 0.33333334, %v593_v42 }
 0x3a6   :  { %v595_v43 = vmul.f32 0.33333334, %v565_v25 }
 0x3a8   :  { %v596_v44 = vadd.f32 %v595_v43, %v594_v26 }
 0x3aa   :  { %v598_v46 = vadd.f32 %v597_v45, %v596_v44 }
 0x3ac   :  { %v602_v47 = vor.u32 %v600_v30, %v598_v46 }
 0x3ae   :  { %604 = vst [vmem:[#allocation11] sm:$0xff] %v602_v47 }
 0x3af   :  { %872 = shalt.err (!%p869_p10)
}
 0x3b0   :  { %614 = dma.vmem_to_hbm [thread:$0]  %s612_s3, 128, %s1079_s4, [#allocation5]  }
 0x3b1   :  { %887 = dma.done.wait [#allocation5], 128  }
 0x3b2   :  { %888 = vsyncadd [#allocation5], 4294967168 }
 0x3b3   :  { %618 = vsyncpa [#allocation4], 1 }
 0x3b4   :  { %619 = vsyncpa [#allocation7], 1 }
 0x3b5   :  { %620 = vsyncpa [#allocation10], 1 }
 0x3b6   :  { %621 = vsyncpa [#allocation5], 1 }

</bundles_post_ra>
